<compile_context>
chip_gen: v5e
topology: v5e:2x2
jax: 0.10.0
libtpu: 0.0.40
codegen_flags: <defaults>
</compile_context>

<pallas_src>
import functools

import jax
import jax.numpy as jnp
from jax.experimental import pallas as pl
from jax.experimental.pallas import tpu as pltpu


# ----------------------------- Pallas kernels ------------------------------

def gate_mask_kernel(x_ref, w_ref, g_ref, mask_ref):
    """GMoEGate + GMoEGateBackward.forward for one token tile.

    mask = sign(relu(sigmoid(normalize(x,1) @ normalize(W,0)) - sigmoid(g)))
         = 1.0 where sigmoid(xn @ wn) > sigmoid(g), else 0.0
    """
    x = x_ref[...].astype(jnp.float32)                          # (TN, D)
    norm = jnp.sqrt(jnp.sum(x * x, axis=1, keepdims=True))
    xn = x / jnp.maximum(norm, 1e-12)                           # F.normalize(x, dim=1)
    logits = jax.nn.sigmoid(
        jnp.dot(xn, w_ref[...], preferred_element_type=jnp.float32))   # (TN, E)
    gates = jax.nn.sigmoid(g_ref[...])                          # (1, E)
    mask_ref[...] = (logits > gates).astype(jnp.float32)


def moe_expert_kernel(x_ref, mask_ref, w1_ref, b1_ref, w2_ref, b2_ref,
                      out_ref, acc_ref):
    """grid = (token_tiles, experts); expert axis is the trailing reduction.

    acc += mask[:, e:e+1] * (relu(x @ W1_e + b1_e) @ W2_e + b2_e)
    """
    e = pl.program_id(1)

    @pl.when(e == 0)
    def _():
        acc_ref[...] = jnp.zeros_like(acc_ref)

    # Lane-dense combine weights: select column e of the resident (TN, E) mask
    # tile in-kernel instead of streaming a last-dim-1 block per expert.
    cols = jax.lax.broadcasted_iota(jnp.int32, mask_ref.shape, 1)
    m = jnp.sum(jnp.where(cols == e, mask_ref[...], 0.0),
                axis=1, keepdims=True)                           # (TN, 1)

    # bf16 operands, f32 accumulation on the MXU.
    h = jnp.dot(x_ref[...], w1_ref[...],
                preferred_element_type=jnp.float32) + b1_ref[...]       # (TN, H)
    h = jnp.maximum(h, 0.0)
    y = jnp.dot(h.astype(w2_ref.dtype), w2_ref[...],
                preferred_element_type=jnp.float32) + b2_ref[...]       # (TN, D)
    acc_ref[...] += m * y

    @pl.when(e == pl.num_programs(1) - 1)
    def _():
        out_ref[...] = acc_ref[...].astype(out_ref.dtype)


# ------------------------------- wrapper ------------------------------------

def gmoe_forward(x, sim_matrix, gate_logits, fc1_w, fc1_b, fc2_w, fc2_b,
                 *, token_tile=128, return_mask=False):
    N, D = x.shape
    E, _, H = fc1_w.shape
    TN = token_tile
    assert N % TN == 0, "pad tokens to a multiple of the token tile"
    n_tiles = N // TN

    # Gate parameter glue (tiny): active columns & column-normalize (dim=0).
    w = sim_matrix[:, :E]
    w = w / jnp.maximum(jnp.sqrt(jnp.sum(w * w, axis=0, keepdims=True)), 1e-12)
    g = gate_logits[:E].reshape(1, E).astype(jnp.float32)

    mask = pl.pallas_call(
        gate_mask_kernel,
        out_shape=jax.ShapeDtypeStruct((N, E), jnp.float32),
        grid_spec=pltpu.PrefetchScalarGridSpec(
            num_scalar_prefetch=0,
            grid=(n_tiles,),
            in_specs=[
                pl.BlockSpec((TN, D), lambda i: (i, 0)),      # x tile
                pl.BlockSpec((D, E), lambda i: (0, 0)),       # normalized sim_matrix
                pl.BlockSpec((1, E), lambda i: (0, 0)),       # gate logits
            ],
            out_specs=pl.BlockSpec((TN, E), lambda i: (i, 0)),
        ),
        compiler_params=pltpu.CompilerParams(
            dimension_semantics=("parallel",)),
    )(x.astype(jnp.float32), w.astype(jnp.float32), g)

    # TODO(synk): tutel moe.top_k_routing capacity limits / exact l_aux formula and the
    # distributed all_to_all are not reproduced; dense unlimited-capacity dispatch with
    # sign(score) combine weights and a tutel-style load-balance aux loss is used.
    me = jnp.mean(mask, axis=0)
    l_aux = jnp.float32(E) * jnp.sum(me * me)

    # bf16 operands for the MXU (f32 accumulation inside the kernel).
    x_bf = x.astype(jnp.bfloat16)
    w1_bf = fc1_w.astype(jnp.bfloat16)
    w2_bf = fc2_w.astype(jnp.bfloat16)
    b1_f = fc1_b.astype(jnp.float32)
    b2_f = fc2_b.astype(jnp.float32)

    # TODO(synk): dense dispatch runs every expert over all tokens; a grouped
    # (sorted-by-expert) dispatch via PrefetchScalarGridSpec scalar offsets would
    # skip inactive (token, expert) pairs. For very large D/H, additionally tile
    # H as an inner reduction axis (important for v7x's 64 MiB VMEM).
    out = pl.pallas_call(
        moe_expert_kernel,
        out_shape=jax.ShapeDtypeStruct((N, D), jnp.float32),
        grid_spec=pltpu.PrefetchScalarGridSpec(
            num_scalar_prefetch=0,
            grid=(n_tiles, E),                                    # E trailing = reduction
            in_specs=[
                pl.BlockSpec((TN, D), lambda i, e: (i, 0)),           # x tile (resident over e)
                pl.BlockSpec((TN, E), lambda i, e: (i, 0)),           # mask tile (resident over e)
                pl.BlockSpec((None, D, H), lambda i, e: (e, 0, 0)),   # fc1_w[e]
                pl.BlockSpec((None, 1, H), lambda i, e: (e, 0, 0)),   # fc1_b[e]
                pl.BlockSpec((None, H, D), lambda i, e: (e, 0, 0)),   # fc2_w[e]
                pl.BlockSpec((None, 1, D), lambda i, e: (e, 0, 0)),   # fc2_b[e]
            ],
            out_specs=pl.BlockSpec((TN, D), lambda i, e: (i, 0)),
            scratch_shapes=[pltpu.VMEM((TN, D), jnp.float32)],        # f32 accumulator
        ),
        compiler_params=pltpu.CompilerParams(
            dimension_semantics=("parallel", "arbitrary")),
    )(x_bf, mask, w1_bf, b1_f, w2_bf, b2_f)

    if return_mask:
        return out, l_aux, mask
    return out, l_aux


# --------------------------------- main --------------------------------------

if __name__ == "__main__":
    N, D, H = 256, 128, 256         # tokens, model_dim, hidden_size (lane-dense)
    E, MAX_E = 8, 64                # num_global_experts, max_expert_num

    key = jax.random.PRNGKey(0)
    k1, k2, k3, k4 = jax.random.split(key, 4)

    x = jax.random.normal(k1, (N, D), jnp.float32)

    # GMoEGate params
    sim_matrix = jax.random.normal(k2, (D, MAX_E), jnp.float32)
    gate_logits = jnp.zeros((MAX_E,), jnp.float32)

    # GMoEExpert params (randn * 0.001, zero biases)
    fc1_w = jax.random.normal(k3, (E, D, H), jnp.float32) * 0.001
    fc2_w = jax.random.normal(k4, (E, H, D), jnp.float32) * 0.001
    fc1_b = jnp.zeros((E, 1, H), jnp.float32)
    fc2_b = jnp.zeros((E, 1, D), jnp.float32)

    fwd = jax.jit(functools.partial(gmoe_forward, return_mask=True))
    out, l_aux, mask = fwd(x, sim_matrix, gate_logits, fc1_w, fc1_b, fc2_w, fc2_b)
    out = jax.block_until_ready(out)
    l_aux = jax.block_until_ready(l_aux)
    mask = jax.block_until_ready(mask)

    # ---- pure-JAX reference check ----
    # Gate / mask reference (allow disagreement only right at the threshold).
    xn = x / jnp.maximum(jnp.linalg.norm(x, axis=1, keepdims=True), 1e-12)
    wv = sim_matrix[:, :E]
    wn = wv / jnp.maximum(jnp.linalg.norm(wv, axis=0, keepdims=True), 1e-12)
    logits_ref = jax.nn.sigmoid(xn @ wn)
    gates_ref = jax.nn.sigmoid(gate_logits[:E])
    mask_exact = (logits_ref > gates_ref).astype(jnp.float32)
    gate_ok = (mask == mask_exact) | (jnp.abs(logits_ref - gates_ref) < 1e-4)
    assert bool(jnp.all(gate_ok)), "gate mask mismatch vs reference"

    # Expert reference mirroring the kernel's bf16-operand / f32-accum numerics.
    prec = jax.lax.Precision.HIGHEST
    xf = x.astype(jnp.bfloat16).astype(jnp.float32)
    w1f = fc1_w.astype(jnp.bfloat16).astype(jnp.float32)
    w2f = fc2_w.astype(jnp.bfloat16).astype(jnp.float32)
    h_exp = jnp.maximum(
        jnp.einsum('nd,edh->enh', xf, w1f, precision=prec) + fc1_b, 0.0)
    h_exp = h_exp.astype(jnp.bfloat16).astype(jnp.float32)
    y_exp = jnp.einsum('enh,ehd->end', h_exp, w2f, precision=prec) + fc2_b
    out_expected = jnp.sum(mask.T[:, :, None] * y_exp, axis=0)

    assert out.shape == (N, D)
    assert jnp.allclose(out, out_expected, atol=1e-6, rtol=1e-3), \
        "output mismatch vs reference"
    assert bool(jnp.isfinite(l_aux))
    print("KERNEL_OK")
</pallas_src>

<mosaic_0001>
module attributes {stable_mosaic.version = 11 : i64} {
  func.func @gate_mask_kernel(%arg0: i32, %arg1: memref<128x128xf32, #tpu.memory_space<vmem>>, %arg2: memref<128x8xf32, #tpu.memory_space<vmem>>, %arg3: memref<1x8xf32, #tpu.memory_space<vmem>>, %arg4: memref<128x8xf32, #tpu.memory_space<vmem>>) attributes {dimension_semantics = [#tpu.dimension_semantics<parallel>], iteration_bounds = array<i64: 2>, scalar_prefetch = 0 : i64, scratch_operands = 0 : i64, tpu.core_type = #tpu.core_type<tc>, window_params = [{transform_indices = @transform_0, window_bounds = array<i64: 128, 128>}, {pipeline_mode = #tpu.pipeline_mode<synchronous>, transform_indices = @transform_1, window_bounds = array<i64: 128, 8>}, {pipeline_mode = #tpu.pipeline_mode<synchronous>, transform_indices = @transform_2, window_bounds = array<i64: 1, 8>}, {transform_indices = @transform_3, window_bounds = array<i64: 128, 8>}]} {
    %c0 = arith.constant 0 : index
    %c0_0 = arith.constant 0 : index
    %0 = vector.load %arg1[%c0, %c0_0] : memref<128x128xf32, #tpu.memory_space<vmem>>, vector<128x128xf32>
    %1 = arith.mulf %0, %0 : vector<128x128xf32>
    %cst = arith.constant dense<0.000000e+00> : vector<128xf32>
    %2 = vector.multi_reduction <add>, %1, %cst [1] : vector<128x128xf32> to vector<128xf32>
    %3 = vector.shape_cast %2 : vector<128xf32> to vector<128x1xf32>
    %4 = math.sqrt %3 : vector<128x1xf32>
    %cst_1 = arith.constant 9.99999996E-13 : f32
    %5 = vector.broadcast %cst_1 : f32 to vector<128x1xf32>
    %6 = arith.maximumf %4, %5 : vector<128x1xf32>
    %7 = vector.broadcast %6 : vector<128x1xf32> to vector<128x128xf32>
    %8 = arith.divf %0, %7 : vector<128x128xf32>
    %c0_2 = arith.constant 0 : index
    %c0_3 = arith.constant 0 : index
    %9 = vector.load %arg2[%c0_2, %c0_3] : memref<128x8xf32, #tpu.memory_space<vmem>>, vector<128x8xf32>
    %cst_4 = arith.constant dense<0.000000e+00> : vector<128x8xf32>
    %10 = tpu.matmul %8, %9, %cst_4 {dimension_numbers = #tpu.dot_dimension_numbers<[1], [0], [0], [1], [0, 0, 1, 1], [], []>} : vector<128x128xf32>, vector<128x8xf32>, vector<128x8xf32> -> vector<128x8xf32>
    %11 = arith.negf %10 : vector<128x8xf32>
    %12 = math.exp %11 : vector<128x8xf32>
    %cst_5 = arith.constant 1.000000e+00 : f32
    %13 = vector.broadcast %cst_5 : f32 to vector<128x8xf32>
    %14 = arith.addf %13, %12 : vector<128x8xf32>
    %15 = arith.divf %13, %14 : vector<128x8xf32>
    %c0_6 = arith.constant 0 : index
    %c0_7 = arith.constant 0 : index
    %16 = vector.load %arg3[%c0_6, %c0_7] : memref<1x8xf32, #tpu.memory_space<vmem>>, vector<1x8xf32>
    %17 = arith.negf %16 : vector<1x8xf32>
    %18 = math.exp %17 : vector<1x8xf32>
    %cst_8 = arith.constant 1.000000e+00 : f32
    %19 = vector.broadcast %cst_8 : f32 to vector<1x8xf32>
    %20 = arith.addf %19, %18 : vector<1x8xf32>
    %21 = arith.divf %19, %20 : vector<1x8xf32>
    %22 = vector.broadcast %21 : vector<1x8xf32> to vector<128x8xf32>
    %23 = arith.cmpf ogt, %15, %22 : vector<128x8xf32>
    %24 = arith.extui %23 : vector<128x8xi1> to vector<128x8xi32>
    %25 = arith.sitofp %24 : vector<128x8xi32> to vector<128x8xf32>
    %c0_9 = arith.constant 0 : index
    %c0_10 = arith.constant 0 : index
    %26 = vector.load %arg4[%c0_9, %c0_10] : memref<128x8xf32, #tpu.memory_space<vmem>>, vector<128x8xf32>
    tpu.vector_store %arg4[%c0_9, %c0_10], %25 {strides = array<i32>} : memref<128x8xf32, #tpu.memory_space<vmem>>, vector<128x8xf32>,
    return
  }
  func.func @transform_0(%arg0: i32) -> (i32, i32) {
    %c0_i32 = arith.constant 0 : i32
    %c0_i32_0 = arith.constant 0 : i32
    return %arg0, %c0_i32 : i32, i32
  }
  func.func @transform_1(%arg0: i32) -> (i32, i32) {
    %c0_i32 = arith.constant 0 : i32
    %c0_i32_0 = arith.constant 0 : i32
    %c0_i32_1 = arith.constant 0 : i32
    return %c0_i32, %c0_i32_0 : i32, i32
  }
  func.func @transform_2(%arg0: i32) -> (i32, i32) {
    %c0_i32 = arith.constant 0 : i32
    %c0_i32_0 = arith.constant 0 : i32
    %c0_i32_1 = arith.constant 0 : i32
    return %c0_i32, %c0_i32_0 : i32, i32
  }
  func.func @transform_3(%arg0: i32) -> (i32, i32) {
    %c0_i32 = arith.constant 0 : i32
    %c0_i32_0 = arith.constant 0 : i32
    return %arg0, %c0_i32 : i32, i32
  }
}

module attributes {stable_mosaic.version = 11 : i64} {
  func.func @moe_expert_kernel(%arg0: i32, %arg1: i32, %arg2: memref<128x128xbf16, #tpu.memory_space<vmem>>, %arg3: memref<128x8xf32, #tpu.memory_space<vmem>>, %arg4: memref<1x128x256xbf16, #tpu.memory_space<vmem>>, %arg5: memref<1x1x256xf32, #tpu.memory_space<vmem>>, %arg6: memref<1x256x128xbf16, #tpu.memory_space<vmem>>, %arg7: memref<1x1x128xf32, #tpu.memory_space<vmem>>, %arg8: memref<128x128xf32, #tpu.memory_space<vmem>>, %arg9: memref<128x128xf32, #tpu.memory_space<vmem>>) attributes {dimension_semantics = [#tpu.dimension_semantics<parallel>, #tpu.dimension_semantics<arbitrary>], iteration_bounds = array<i64: 2, 8>, scalar_prefetch = 0 : i64, scratch_operands = 1 : i64, tpu.core_type = #tpu.core_type<tc>, window_params = [{transform_indices = @transform_0, window_bounds = array<i64: 128, 128>}, {transform_indices = @transform_1, window_bounds = array<i64: 128, 8>}, {transform_indices = @transform_2, window_bounds = array<i64: 1, 128, 256>}, {transform_indices = @transform_3, window_bounds = array<i64: 1, 1, 256>}, {transform_indices = @transform_4, window_bounds = array<i64: 1, 256, 128>}, {transform_indices = @transform_5, window_bounds = array<i64: 1, 1, 128>}, {transform_indices = @transform_6, window_bounds = array<i64: 128, 128>}]} {
    %c0_i32 = arith.constant 0 : i32
    %0 = arith.cmpi eq, %arg1, %c0_i32 : i32
    %1 = arith.extui %0 : i1 to i32
    %c0_i32_0 = arith.constant 0 : i32
    %2 = arith.cmpi ne, %1, %c0_i32_0 : i32
    scf.if %2 {
      %cst_25 = arith.constant 0.000000e+00 : f32
      %37 = vector.broadcast %cst_25 : f32 to vector<128x128xf32>
      %c0_26 = arith.constant 0 : index
      %c0_27 = arith.constant 0 : index
      %38 = vector.load %arg9[%c0_26, %c0_27] : memref<128x128xf32, #tpu.memory_space<vmem>>, vector<128x128xf32>
      tpu.vector_store %arg9[%c0_26, %c0_27], %37 {strides = array<i32>} : memref<128x128xf32, #tpu.memory_space<vmem>>, vector<128x128xf32>,
    } else {
    }
    %3 = tpu.iota {dimensions = array<i32: 1>} : vector<128x8xi32>
    %4 = vector.broadcast %arg1 : i32 to vector<128x8xi32>
    %5 = arith.cmpi eq, %3, %4 : vector<128x8xi32>
    %c0 = arith.constant 0 : index
    %c0_1 = arith.constant 0 : index
    %6 = vector.load %arg3[%c0, %c0_1] : memref<128x8xf32, #tpu.memory_space<vmem>>, vector<128x8xf32>
    %cst = arith.constant 0.000000e+00 : f32
    %7 = vector.broadcast %cst : f32 to vector<128x8xf32>
    %8 = arith.select %5, %6, %7 : vector<128x8xi1>, vector<128x8xf32>
    %cst_2 = arith.constant dense<0.000000e+00> : vector<128xf32>
    %9 = vector.multi_reduction <add>, %8, %cst_2 [1] : vector<128x8xf32> to vector<128xf32>
    %10 = vector.shape_cast %9 : vector<128xf32> to vector<128x1xf32>
    %c0_3 = arith.constant 0 : index
    %c0_4 = arith.constant 0 : index
    %11 = vector.load %arg2[%c0_3, %c0_4] : memref<128x128xbf16, #tpu.memory_space<vmem>>, vector<128x128xbf16>
    %c0_5 = arith.constant 0 : index
    %c0_6 = arith.constant 0 : index
    %c0_7 = arith.constant 0 : index
    %12 = vector.load %arg4[%c0_5, %c0_6, %c0_7] : memref<1x128x256xbf16, #tpu.memory_space<vmem>>, vector<1x128x256xbf16>
    %13 = vector.shape_cast %12 : vector<1x128x256xbf16> to vector<128x256xbf16>
    %cst_8 = arith.constant dense<0.000000e+00> : vector<128x256xf32>
    %14 = tpu.matmul %11, %13, %cst_8 {dimension_numbers = #tpu.dot_dimension_numbers<[1], [0], [0], [1], [0, 0, 1, 1], [], []>} : vector<128x128xbf16>, vector<128x256xbf16>, vector<128x256xf32> -> vector<128x256xf32>
    %c0_9 = arith.constant 0 : index
    %c0_10 = arith.constant 0 : index
    %c0_11 = arith.constant 0 : index
    %15 = vector.load %arg5[%c0_9, %c0_10, %c0_11] : memref<1x1x256xf32, #tpu.memory_space<vmem>>, vector<1x1x256xf32>
    %16 = vector.shape_cast %15 : vector<1x1x256xf32> to vector<1x256xf32>
    %17 = vector.broadcast %16 : vector<1x256xf32> to vector<128x256xf32>
    %18 = arith.addf %14, %17 : vector<128x256xf32>
    %cst_12 = arith.constant 0.000000e+00 : f32
    %19 = vector.broadcast %cst_12 : f32 to vector<128x256xf32>
    %20 = arith.maximumf %18, %19 : vector<128x256xf32>
    %21 = arith.truncf %20 : vector<128x256xf32> to vector<128x256xbf16>
    %c0_13 = arith.constant 0 : index
    %c0_14 = arith.constant 0 : index
    %c0_15 = arith.constant 0 : index
    %22 = vector.load %arg6[%c0_13, %c0_14, %c0_15] : memref<1x256x128xbf16, #tpu.memory_space<vmem>>, vector<1x256x128xbf16>
    %23 = vector.shape_cast %22 : vector<1x256x128xbf16> to vector<256x128xbf16>
    %cst_16 = arith.constant dense<0.000000e+00> : vector<128x128xf32>
    %24 = tpu.matmul %21, %23, %cst_16 {dimension_numbers = #tpu.dot_dimension_numbers<[1], [0], [0], [1], [0, 0, 1, 1], [], []>} : vector<128x256xbf16>, vector<256x128xbf16>, vector<128x128xf32> -> vector<128x128xf32>
    %c0_17 = arith.constant 0 : index
    %c0_18 = arith.constant 0 : index
    %c0_19 = arith.constant 0 : index
    %25 = vector.load %arg7[%c0_17, %c0_18, %c0_19] : memref<1x1x128xf32, #tpu.memory_space<vmem>>, vector<1x1x128xf32>
    %26 = vector.shape_cast %25 : vector<1x1x128xf32> to vector<1x128xf32>
    %27 = vector.broadcast %26 : vector<1x128xf32> to vector<128x128xf32>
    %28 = arith.addf %24, %27 : vector<128x128xf32>
    %c0_20 = arith.constant 0 : index
    %c0_21 = arith.constant 0 : index
    %29 = vector.load %arg9[%c0_20, %c0_21] : memref<128x128xf32, #tpu.memory_space<vmem>>, vector<128x128xf32>
    %30 = vector.broadcast %10 : vector<128x1xf32> to vector<128x128xf32>
    %31 = arith.mulf %30, %28 : vector<128x128xf32>
    %32 = arith.addf %29, %31 : vector<128x128xf32>
    %c0_22 = arith.constant 0 : index
    %c0_23 = arith.constant 0 : index
    %33 = vector.load %arg9[%c0_22, %c0_23] : memref<128x128xf32, #tpu.memory_space<vmem>>, vector<128x128xf32>
    tpu.vector_store %arg9[%c0_22, %c0_23], %32 {strides = array<i32>} : memref<128x128xf32, #tpu.memory_space<vmem>>, vector<128x128xf32>,
    %c7_i32 = arith.constant 7 : i32
    %34 = arith.cmpi eq, %arg1, %c7_i32 : i32
    %35 = arith.extui %34 : i1 to i32
    %c0_i32_24 = arith.constant 0 : i32
    %36 = arith.cmpi ne, %35, %c0_i32_24 : i32
    scf.if %36 {
      %c0_25 = arith.constant 0 : index
      %c0_26 = arith.constant 0 : index
      %37 = vector.load %arg9[%c0_25, %c0_26] : memref<128x128xf32, #tpu.memory_space<vmem>>, vector<128x128xf32>
      %c0_27 = arith.constant 0 : index
      %c0_28 = arith.constant 0 : index
      %38 = vector.load %arg8[%c0_27, %c0_28] : memref<128x128xf32, #tpu.memory_space<vmem>>, vector<128x128xf32>
      tpu.vector_store %arg8[%c0_27, %c0_28], %37 {strides = array<i32>} : memref<128x128xf32, #tpu.memory_space<vmem>>, vector<128x128xf32>,
    } else {
    }
    return
  }
  func.func @transform_0(%arg0: i32, %arg1: i32) -> (i32, i32) {
    %c0_i32 = arith.constant 0 : i32
    %c0_i32_0 = arith.constant 0 : i32
    return %arg0, %c0_i32 : i32, i32
  }
  func.func @transform_1(%arg0: i32, %arg1: i32) -> (i32, i32) {
    %c0_i32 = arith.constant 0 : i32
    %c0_i32_0 = arith.constant 0 : i32
    return %arg0, %c0_i32 : i32, i32
  }
  func.func @transform_2(%arg0: i32, %arg1: i32) -> (i32, i32, i32) {
    %c0_i32 = arith.constant 0 : i32
    %c0_i32_0 = arith.constant 0 : i32
    %c0_i32_1 = arith.constant 0 : i32
    return %arg1, %c0_i32, %c0_i32_0 : i32, i32, i32
  }
  func.func @transform_3(%arg0: i32, %arg1: i32) -> (i32, i32, i32) {
    %c0_i32 = arith.constant 0 : i32
    %c0_i32_0 = arith.constant 0 : i32
    %c0_i32_1 = arith.constant 0 : i32
    return %arg1, %c0_i32, %c0_i32_0 : i32, i32, i32
  }
  func.func @transform_4(%arg0: i32, %arg1: i32) -> (i32, i32, i32) {
    %c0_i32 = arith.constant 0 : i32
    %c0_i32_0 = arith.constant 0 : i32
    %c0_i32_1 = arith.constant 0 : i32
    return %arg1, %c0_i32, %c0_i32_0 : i32, i32, i32
  }
  func.func @transform_5(%arg0: i32, %arg1: i32) -> (i32, i32, i32) {
    %c0_i32 = arith.constant 0 : i32
    %c0_i32_0 = arith.constant 0 : i32
    %c0_i32_1 = arith.constant 0 : i32
    return %arg1, %c0_i32, %c0_i32_0 : i32, i32, i32
  }
  func.func @transform_6(%arg0: i32, %arg1: i32) -> (i32, i32) {
    %c0_i32 = arith.constant 0 : i32
    %c0_i32_0 = arith.constant 0 : i32
    return %arg0, %c0_i32 : i32, i32
  }
}

</mosaic_0001>

<bundles_post_ra>
// kernel: gmoe_forward.2
= control target key start
LH: loop header
LB: loop body
LE: loop exit
PB: predicated region body
PF: predicated region fallthrough
CT: control target
= control target key end

     0   :  { %s1485_s12 = smov 0   ;;  %s2375_s0 = inlined_call_operand.vmem [shape: f32[256,128], index: 0, kind: input, shape index: {}]   ;;  %s2376_s1 = inlined_call_operand.vmem [shape: f32[128,8], index: 1, kind: input, shape index: {}]   ;;  %s2377_s2 = inlined_call_operand.vmem [shape: f32[1,8], index: 2, kind: input, shape index: {}]   ;;  %s2378_s3 = inlined_call_operand.vmem [shape: f32[256,8], index: 3, kind: output, shape index: {}]  }
   0x1 LB: > { %s1215_s13 = sadd.s32 4294967295, %s1462_s12   ;;  %p1219_p0 = scmp.ge.s32.totalorder %s1462_s12, 1  ;;  %s1462_s12 = sphi %s1485_s12, %s13_s12  }
   0x2   : > { %p138_p1 = scmp.lt.s32.totalorder %s1462_s12, 3 }
   0x4   : > { %p139_p2 = pnand %p1219_p0, %p138_p1 }
   0x5   : > { %s1220_s14 = sshll.u32 (!%p139_p2), %s1215_s13, 4 }
   0x6   : > { %142 = sbr.rel (%p139_p2) target bundleno = 425 (0x1a9), region = 32  ;;  %p163_p3 = scmp.lt.s32.totalorder (!%p139_p2), %s1220_s14, 31 }
   0xb   : > { %s2416_s14 = smov (!%p163_p3, %s1220_s14), 31  ;;  %v701_v32 = vld [vmem:[%s2376_s1 + $0x78] sm:$0xff]  ;;  %v700_v33 = vld [vmem:[%s2376_s1 + $0x70] sm:$0xff]  ;;  %v699_v34 = vld [vmem:[%s2376_s1 + $0x68] sm:$0xff] }
   0xc   : > { %s1221_s15 = sshll.u32 %s2416_s14, 3  ;;  %702 = vmatpush.msra.mxu0 %v701_v32  ;;  %1260 = vmatpush.msra.mxu2 %v701_v32  ;;  %v698_v35 = vld [vmem:[%s2376_s1 + $0x60] sm:$0xff]  ;;  %v697_v36 = vld [vmem:[%s2376_s1 + $0x58] sm:$0xff]  ;;  %v696_v37 = vld [vmem:[%s2376_s1 + $0x50] sm:$0xff] }
   0xd   : > { %s1501_s18 = scalar_lea.vmem %s2375_s0, %s1221_s15  ;;  %1259 = vmatpush.msra.mxu1 %v701_v32  ;;  %1261 = vmatpush.msra.mxu3 %v701_v32  ;;  %v695_v38 = vld [vmem:[%s2376_s1 + $0x48] sm:$0xff]  ;;  %v694_v41 = vld [vmem:[%s2376_s1 + $0x40] sm:$0xff]  ;;  %v693_v43 = vld [vmem:[%s2376_s1 + $0x38] sm:$0xff]  ;;  %s2165_s4 = scalar_lea.vmem %s2378_s3, %s1221_s15 }
   0xe   : > { %v1504_v0 = vld [vmem:[%s1501_s18 + $0x48] sm:$0xff]  ;;  %v1507_v1 = vld [vmem:[%s1501_s18 + $0x40] sm:$0xff]  ;;  %v1530_v12 = vld [vmem:[%s1501_s18 + $0x50] sm:$0xff]  ;;  %703 = vmatpush.msra.mxu0 %v700_v33  ;;  %1263 = vmatpush.msra.mxu2 %v700_v33 }
   0xf   : > { %v1510_v2 = vld [vmem:[%s1501_s18] sm:$0xff]  ;;  %v199_v3 = vmul.f32 %v1504_v0, %v1504_v0  ;;  %v198_v4 = vmul.f32 %v1507_v1, %v1507_v1  ;;  %v187_v6 = vld [vmem:[%s1501_s18 + $0x68] sm:$0xff]  ;;  %v200_v15 = vmul.f32 %v1530_v12, %v1530_v12  ;;  %v180_v18 = vld [vmem:[%s1501_s18 + $0x30] sm:$0xff]  ;;  %1262 = vmatpush.msra.mxu1 %v700_v33  ;;  %1264 = vmatpush.msra.mxu3 %v700_v33 }
  0x10   : > { %v190_v5 = vmul.f32 %v1510_v2, %v1510_v2  ;;  %v1520_v7 = vld [vmem:[%s1501_s18 + $0x60] sm:$0xff]  ;;  %v203_v9 = vmul.f32 %v187_v6, %v187_v6  ;;  %v1533_v13 = vld [vmem:[%s1501_s18 + $0x8] sm:$0xff]  ;;  %v188_v19 = vld [vmem:[%s1501_s18 + $0x70] sm:$0xff]  ;;  %v196_v21 = vmul.f32 %v180_v18, %v180_v18  ;;  %704 = vmatpush.msra.mxu0 %v699_v34  ;;  %1266 = vmatpush.msra.mxu2 %v699_v34 }
  0x11   : > { %224 = vadd.xlane.f32.xlu2 %v199_v3  ;;  %222 = vadd.xlane.f32.xlu0 %v198_v4  ;;  %v1523_v8 = vld [vmem:[%s1501_s18 + $0x20] sm:$0xff]  ;;  %v202_v10 = vmul.f32 %v1520_v7, %v1520_v7  ;;  %v1536_v14 = vld [vmem:[%s1501_s18 + $0x28] sm:$0xff]  ;;  %v191_v16 = vmul.f32 %v1533_v13, %v1533_v13  ;;  %v176_v20 = vld [vmem:[%s1501_s18 + $0x10] sm:$0xff]  ;;  %v204_v22 = vmul.f32 %v188_v19, %v188_v19 }
  0x12   : > { %206 = vadd.xlane.f32.xlu1 %v190_v5  ;;  %v194_v11 = vmul.f32 %v1523_v8, %v1523_v8  ;;  %v195_v17 = vmul.f32 %v1536_v14, %v1536_v14  ;;  %v192_v23 = vmul.f32 %v176_v20, %v176_v20  ;;  %v177_v24 = vld [vmem:[%s1501_s18 + $0x18] sm:$0xff]  ;;  %1265 = vmatpush.msra.mxu1 %v699_v34  ;;  %v692_v44 = vld [vmem:[%s2376_s1 + $0x30] sm:$0xff]  ;;  %v691_v45 = vld [vmem:[%s2376_s1 + $0x28] sm:$0xff] }
  0x13   : > { %v185_v25 = vld [vmem:[%s1501_s18 + $0x58] sm:$0xff]  ;;  %v193_v27 = vmul.f32 %v177_v24, %v177_v24  ;;  %1267 = vmatpush.msra.mxu3 %v699_v34  ;;  %705 = vmatpush.msra.mxu0 %v698_v35  ;;  %v690_v51 = vld [vmem:[%s2376_s1 + $0x20] sm:$0xff]  ;;  %v688_v59 = vld [vmem:[%s2376_s1 + $0x10] sm:$0xff] }
  0x14   : > { %v189_v26 = vld [vmem:[%s1501_s18 + $0x78] sm:$0xff]  ;;  %v201_v28 = vmul.f32 %v185_v25, %v185_v25  ;;  %1269 = vmatpush.msra.mxu2 %v698_v35  ;;  %1268 = vmatpush.msra.mxu1 %v698_v35  ;;  %v687_v62 = vld [vmem:[%s2376_s1 + $0x8] sm:$0xff] }
  0x15   : > { %v205_v29 = vmul.f32 %v189_v26, %v189_v26  ;;  %v181_v30 = vld [vmem:[%s1501_s18 + $0x38] sm:$0xff]  ;;  %1270 = vmatpush.msra.mxu3 %v698_v35  ;;  %706 = vmatpush.msra.mxu0 %v697_v36 }
  0x16   : > { %v197_v31 = vmul.f32 %v181_v30, %v181_v30  ;;  %1272 = vmatpush.msra.mxu2 %v697_v36  ;;  %1271 = vmatpush.msra.mxu1 %v697_v36  ;;  %v689_v57 = vld [vmem:[%s2376_s1 + $0x18] sm:$0xff] }
  0x17   : > { %1273 = vmatpush.msra.mxu3 %v697_v36  ;;  %707 = vmatpush.msra.mxu0 %v696_v37 }
  0x18   : > { %1275 = vmatpush.msra.mxu2 %v696_v37  ;;  %1274 = vmatpush.msra.mxu1 %v696_v37 }
  0x19   : > { %232 = vadd.xlane.f32.xlu2 %v203_v9  ;;  %230 = vadd.xlane.f32.xlu0 %v202_v10  ;;  %v686_v10 = vld [vmem:[%s2376_s1] sm:$0xff] }
  0x1a   : > { %214 = vadd.xlane.f32.xlu1 %v194_v11  ;;  %1276 = vmatpush.msra.mxu3 %v696_v37 }
  0x1b   : > { %708 = vmatpush.msra.mxu0 %v695_v38  ;;  %1278 = vmatpush.msra.mxu2 %v695_v38 }
  0x1c   : > { %1277 = vmatpush.msra.mxu1 %v695_v38  ;;  %1279 = vmatpush.msra.mxu3 %v695_v38 }
  0x1d   : > { %709 = vmatpush.msra.mxu0 %v694_v41  ;;  %1281 = vmatpush.msra.mxu2 %v694_v41 }
  0x1e   : > { %1280 = vmatpush.msra.mxu1 %v694_v41  ;;  %1282 = vmatpush.msra.mxu3 %v694_v41 }
  0x1f   : > { %710 = vmatpush.msra.mxu0 %v693_v43  ;;  %1284 = vmatpush.msra.mxu2 %v693_v43 }
  0x20   : > { %1283 = vmatpush.msra.mxu1 %v693_v43  ;;  %1285 = vmatpush.msra.mxu3 %v693_v43 }
  0x21   : > { %226 = vadd.xlane.f32.xlu2 %v200_v15  ;;  %208 = vadd.xlane.f32.xlu0 %v191_v16 }
  0x22   : > { %216 = vadd.xlane.f32.xlu1 %v195_v17  ;;  %711 = vmatpush.msra.mxu0 %v692_v44 }
  0x23   : > { %1287 = vmatpush.msra.mxu2 %v692_v44  ;;  %1286 = vmatpush.msra.mxu1 %v692_v44 }
  0x24   : > { %1288 = vmatpush.msra.mxu3 %v692_v44  ;;  %712 = vmatpush.msra.mxu0 %v691_v45 }
  0x25   : > { %1290 = vmatpush.msra.mxu2 %v691_v45  ;;  %1289 = vmatpush.msra.mxu1 %v691_v45 }
  0x26   : > { %1291 = vmatpush.msra.mxu3 %v691_v45  ;;  %713 = vmatpush.msra.mxu0 %v690_v51 }
  0x27   : > { %1293 = vmatpush.msra.mxu2 %v690_v51  ;;  %1292 = vmatpush.msra.mxu1 %v690_v51 }
  0x28   : > { %1294 = vmatpush.msra.mxu3 %v690_v51  ;;  %714 = vmatpush.msra.mxu0 %v689_v57 }
  0x29   : > { %218 = vadd.xlane.f32.xlu2 %v196_v21  ;;  %234 = vadd.xlane.f32.xlu0 %v204_v22 }
  0x2a   : > { %210 = vadd.xlane.f32.xlu1 %v192_v23  ;;  %1296 = vmatpush.msra.mxu2 %v689_v57 }
  0x2b   : > { %1295 = vmatpush.msra.mxu1 %v689_v57  ;;  %1297 = vmatpush.msra.mxu3 %v689_v57 }
  0x2c   : > { %715 = vmatpush.msra.mxu0 %v688_v59  ;;  %1299 = vmatpush.msra.mxu2 %v688_v59 }
  0x2d   : > { %1298 = vmatpush.msra.mxu1 %v688_v59  ;;  %1300 = vmatpush.msra.mxu3 %v688_v59 }
  0x2e   : > { %716 = vmatpush.msra.mxu0 %v687_v62  ;;  %1302 = vmatpush.msra.mxu2 %v687_v62 }
  0x2f   : > { %1301 = vmatpush.msra.mxu1 %v687_v62  ;;  %1303 = vmatpush.msra.mxu3 %v687_v62 }
  0x30   : > { %717 = vmatpush.msra.mxu0 %v686_v10  ;;  %1305 = vmatpush.msra.mxu2 %v686_v10 }
  0x31   : > { %212 = vadd.xlane.f32.xlu2 %v193_v27  ;;  %228 = vadd.xlane.f32.xlu0 %v201_v28 }
  0x32   : > { %236 = vadd.xlane.f32.xlu1 %v205_v29  ;;  %1304 = vmatpush.msra.mxu1 %v686_v10 }
  0x33   : > { %1306 = vmatpush.msra.mxu3 %v686_v10 }
  0x39   : > { %220 = vadd.xlane.f32.xlu0 %v197_v31 }
  0x84   : > { %v1572_v39 = vpop.xlane.xlu2 %224  ;;  %v1574_v40 = vpop.xlane.xlu0 %222 }
  0x85   : > { %1316 = vrsqrt.f32 %v1572_v39  ;;  %v1580_v42 = vpop.xlane.xlu1 %206  ;;  %vm353_vm0 = vcmp.eq.f32.partialorder %v1572_v39, inf  ;;  %vm355_vm1 = vcmp.eq.f32.partialorder %v1572_v39, 0.0  ;;  %v356_v29 = vand.u32 2147483648, %v1572_v39 }
  0x86   : > { %1318 = vrsqrt.f32 %v1574_v40  ;;  %vm341_vm2 = vcmp.eq.f32.partialorder %v1574_v40, inf  ;;  %v344_v37 = vand.u32 2147483648, %v1574_v40  ;;  %vm245_vm3 = vcmp.eq.f32.partialorder %v1580_v42, inf }
  0x87   : > { %1320 = vrsqrt.f32 %v1580_v42  ;;  %vm343_vm4 = vcmp.eq.f32.partialorder %v1574_v40, 0.0  ;;  %vm247_vm5 = vcmp.eq.f32.partialorder %v1580_v42, 0.0 }
  0x8b   : > { %v1593_v46 = vpop.eup %1316 }
  0x8c   : > { %v1595_v47 = vpop.eup %1318  ;;  %v347_v48 = vmul.f32 %v1593_v46, %v1572_v39  ;;  %v1599_v49 = vpop.xlane.xlu2 %232 }
  0x8d   : > { %v1601_v50 = vpop.xlane.xlu0 %230  ;;  %v1606_v52 = vpop.eup %1320  ;;  %v335_v53 = vmul.f32 %v1595_v47, %v1574_v40  ;;  %1322 = vrsqrt.f32 %v1599_v49  ;;  %vm401_vm6 = vcmp.eq.f32.partialorder %v1599_v49, inf  ;;  %vm403_vm9 = vcmp.eq.f32.partialorder %v1599_v49, 0.0 }
  0x8e   : > { %v1611_v54 = vpop.xlane.xlu1 %214  ;;  %v348_v55 = vmul.f32 %v1593_v46, %v347_v48  ;;  %v239_v56 = vmul.f32 %v1606_v52, %v1580_v42  ;;  %1324 = vrsqrt.f32 %v1601_v50  ;;  %vm389_vm7 = vcmp.eq.f32.partialorder %v1601_v50, inf }
  0x8f   : > { %v336_v58 = vmul.f32 %v1595_v47, %v335_v53  ;;  %1326 = vrsqrt.f32 %v1611_v54  ;;  %vm293_vm8 = vcmp.eq.f32.partialorder %v1611_v54, inf  ;;  %vm391_vm10 = vcmp.eq.f32.partialorder %v1601_v50, 0.0 }
  0x90   : > { %v349_v60 = vmul.f32 0.5, %v348_v55  ;;  %v240_v61 = vmul.f32 %v1606_v52, %v239_v56  ;;  %v392_v55 = vand.u32 2147483648, %v1601_v50  ;;  %vm295_vm11 = vcmp.eq.f32.partialorder %v1611_v54, 0.0 }
  0x91   : > { %v337_v4 = vmul.f32 0.5, %v336_v58 }
  0x92   : > { %v350_v11 = vsub.f32 1.5, %v349_v60  ;;  %v241_v15 = vmul.f32 0.5, %v240_v61 }
  0x93   : > { %v1323_v63 = vpop.eup %1322  ;;  %v338_v22 = vsub.f32 1.5, %v337_v4  ;;  %v296_v4 = vand.u32 2147483648, %v1611_v54 }
  0x94   : > { %v1629_v3 = vpop.eup %1324  ;;  %v395_v5 = vmul.f32 %v1323_v63, %v1599_v49  ;;  %v1632_v6 = vpop.xlane.xlu2 %226  ;;  %v351_v24 = vmul.f32 %v1593_v46, %v350_v11  ;;  %v242_v25 = vsub.f32 1.5, %v241_v15  ;;  %v248_v46 = vand.u32 2147483648, %v1580_v42 }
  0x95   : > { %v1634_v9 = vpop.xlane.xlu0 %208  ;;  %v383_v16 = vmul.f32 %v1629_v3, %v1601_v50  ;;  %1328 = vrsqrt.f32 %v1632_v6  ;;  %v1327_v18 = vpop.eup %1326  ;;  %v339_v31 = vmul.f32 %v1595_v47, %v338_v22  ;;  %v404_v47 = vand.u32 2147483648, %v1599_v49 }
  0x96   : > { %v1642_v17 = vpop.xlane.xlu1 %216  ;;  %v396_v19 = vmul.f32 %v1323_v63, %v395_v5  ;;  %v287_v21 = vmul.f32 %v1327_v18, %v1611_v54  ;;  %1330 = vrsqrt.f32 %v1634_v9  ;;  %v352_v36 = vmul.f32 %v351_v24, %v1572_v39 }
  0x97   : > { %v384_v20 = vmul.f32 %v1629_v3, %v383_v16  ;;  %1332 = vrsqrt.f32 %v1642_v17  ;;  %v243_v38 = vmul.f32 %v1606_v52, %v242_v25  ;;  %v340_v52 = vmul.f32 %v339_v31, %v1574_v40 }
  0x98   : > { %v397_v23 = vmul.f32 0.5, %v396_v19  ;;  %v288_v26 = vmul.f32 %v1327_v18, %v287_v21  ;;  %v354_v57 = vsel %vm353_vm0, %v1572_v39, %v352_v36  ;;  %v368_v5 = vand.u32 2147483648, %v1632_v6 }
  0x99   : > { %v385_v27 = vmul.f32 0.5, %v384_v20  ;;  %v244_v58 = vmul.f32 %v243_v38, %v1580_v42  ;;  %v1690_v16 = vsel %vm355_vm1, %v356_v29, %v354_v57  ;;  %vm365_vm12 = vcmp.eq.f32.partialorder %v1632_v6, inf }
  0x9a   : > { %v289_v30 = vmul.f32 0.5, %v288_v26  ;;  %v398_v32 = vsub.f32 1.5, %v397_v23  ;;  %vm367_vm13 = vcmp.eq.f32.partialorder %v1632_v6, 0.0  ;;  %vm257_vm14 = vcmp.eq.f32.partialorder %v1634_v9, inf }
  0x9b   : > { %v1329_v28 = vpop.eup %1328  ;;  %v386_v43 = vsub.f32 1.5, %v385_v27  ;;  %v246_v39 = vsel %vm245_vm3, %v1580_v42, %v244_v58  ;;  %vm259_vm15 = vcmp.eq.f32.partialorder %v1634_v9, 0.0  ;;  %vm305_vm0 = vcmp.eq.f32.partialorder %v1642_v17, inf }
  0x9c   : > { %v359_v33 = vmul.f32 %v1329_v28, %v1632_v6  ;;  %v1655_v34 = vpop.xlane.xlu2 %218  ;;  %v1331_v41 = vpop.eup %1330  ;;  %v290_v44 = vsub.f32 1.5, %v289_v30  ;;  %v399_v53 = vmul.f32 %v1323_v63, %v398_v32  ;;  %vm307_vm1 = vcmp.eq.f32.partialorder %v1642_v17, 0.0 }
  0x9d   : > { %v1657_v35 = vpop.xlane.xlu0 %234  ;;  %1334 = vrsqrt.f32 %v1655_v34  ;;  %v251_v48 = vmul.f32 %v1331_v41, %v1634_v9  ;;  %v1333_v60 = vpop.eup %1332  ;;  %v387_v61 = vmul.f32 %v1629_v3, %v386_v43  ;;  %v342_v3 = vsel %vm341_vm2, %v1574_v40, %v340_v52 }
  0x9e   : > { %v360_v45 = vmul.f32 %v1329_v28, %v359_v33  ;;  %v1670_v51 = vpop.xlane.xlu1 %210  ;;  %v291_v62 = vmul.f32 %v1327_v18, %v290_v44  ;;  %1336 = vrsqrt.f32 %v1657_v35  ;;  %v299_v11 = vmul.f32 %v1333_v60, %v1642_v17 }
  0x9f   : > { %v252_v59 = vmul.f32 %v1331_v41, %v251_v48  ;;  %v400_v18 = vmul.f32 %v399_v53, %v1599_v49  ;;  %1338 = vrsqrt.f32 %v1670_v51  ;;  %v388_v24 = vmul.f32 %v387_v61, %v1601_v50 }
  0xa0   : > { %v361_v56 = vmul.f32 0.5, %v360_v45  ;;  %v300_v22 = vmul.f32 %v1333_v60, %v299_v11  ;;  %v292_v25 = vmul.f32 %v291_v62, %v1611_v54  ;;  %v1714_v27 = vsel %vm343_vm4, %v344_v37, %v342_v3 }
  0xa1   : > { %v253_v10 = vmul.f32 0.5, %v252_v59  ;;  %v1719_v33 = vsel %vm247_vm5, %v248_v46, %v246_v39  ;;  %v402_v36 = vsel %vm401_vm6, %v1599_v49, %v400_v18  ;;  %v260_v40 = vand.u32 2147483648, %v1634_v9 }
  0xa2   : > { %v362_v63 = vsub.f32 1.5, %v361_v56  ;;  %v301_v30 = vmul.f32 0.5, %v300_v22  ;;  %v308_v37 = vand.u32 2147483648, %v1642_v17  ;;  %v390_v43 = vsel %vm389_vm7, %v1601_v50, %v388_v24 }
  0xa3   : > { %v1686_v15 = vpop.eup %1334  ;;  %v254_v21 = vsub.f32 1.5, %v253_v10  ;;  %v294_v44 = vsel %vm293_vm8, %v1611_v54, %v292_v25  ;;  %v1742_v48 = vsel %vm403_vm9, %v404_v47, %v402_v36  ;;  %v320_v53 = vand.u32 2147483648, %v1655_v34 }
  0xa4   : > { %v1699_v19 = vpop.xlane.xlu2 %212  ;;  %v311_v23 = vmul.f32 %v1686_v15, %v1655_v34  ;;  %v363_v26 = vmul.f32 %v1329_v28, %v362_v63  ;;  %v1337_v32 = vpop.eup %1336  ;;  %v302_v28 = vsub.f32 1.5, %v301_v30  ;;  %v1755_v49 = vsel %vm391_vm10, %v392_v55, %v390_v43 }
  0xa5   : > { %v1701_v20 = vpop.xlane.xlu0 %228  ;;  %1340 = vrsqrt.f32 %v1699_v19  ;;  %v255_v29 = vmul.f32 %v1331_v41, %v254_v21  ;;  %v1339_v41 = vpop.eup %1338  ;;  %v407_v46 = vmul.f32 %v1337_v32, %v1657_v35  ;;  %v1759_v47 = vsel %vm295_vm11, %v296_v4, %v294_v44 }
  0xa6   : > { %v312_v31 = vmul.f32 %v1686_v15, %v311_v23  ;;  %1342 = vrsqrt.f32 %v1701_v20  ;;  %v1730_v38 = vpop.xlane.xlu1 %236  ;;  %v364_v45 = vmul.f32 %v363_v26, %v1632_v6  ;;  %v263_v56 = vmul.f32 %v1339_v41, %v1670_v51 }
  0xa7   : > { %v256_v52 = vmul.f32 %v255_v29, %v1634_v9  ;;  %v303_v58 = vmul.f32 %v1333_v60, %v302_v28  ;;  %v408_v61 = vmul.f32 %v1337_v32, %v407_v46  ;;  %1344 = vrsqrt.f32 %v1730_v38 }
  0xa8   : > { %v313_v42 = vmul.f32 0.5, %v312_v31  ;;  %v264_v63 = vmul.f32 %v1339_v41, %v263_v56  ;;  %v366_v11 = vsel %vm365_vm12, %v1632_v6, %v364_v45  ;;  %v416_v18 = vand.u32 2147483648, %v1657_v35 }
  0xa9   : > { %v409_v3 = vmul.f32 0.5, %v408_v61  ;;  %v258_v50 = vsel %vm257_vm14, %v1634_v9, %v256_v52  ;;  %vm317_vm2 = vcmp.eq.f32.partialorder %v1655_v34, inf  ;;  %v272_v55 = vand.u32 2147483648, %v1670_v51 }
  0xaa   : > { %v314_v59 = vsub.f32 1.5, %v313_v42  ;;  %v265_v54 = vmul.f32 0.5, %v264_v63  ;;  %v304_v39 = vmul.f32 %v303_v58, %v1642_v17  ;;  %vm413_vm3 = vcmp.eq.f32.partialorder %v1657_v35, inf }
  0xab   : > { %v1341_v57 = vpop.eup %1340  ;;  %v410_v22 = vsub.f32 1.5, %v409_v3  ;;  %vm281_vm4 = vcmp.eq.f32.partialorder %v1699_v19, inf  ;;  %v1782_v24 = vsel %vm367_vm13, %v368_v5, %v366_v11  ;;  %vm269_vm5 = vcmp.eq.f32.partialorder %v1670_v51, inf }
  0xac   : > { %v275_v10 = vmul.f32 %v1341_v57, %v1699_v19  ;;  %v1343_v60 = vpop.eup %1342  ;;  %v315_v21 = vmul.f32 %v1686_v15, %v314_v59  ;;  %v266_v25 = vsub.f32 1.5, %v265_v54  ;;  %v284_v29 = vand.u32 2147483648, %v1699_v19 }
  0xad   : > { %v1749_v62 = vpop.xlane.xlu0 %220  ;;  %v371_v23 = vmul.f32 %v1343_v60, %v1701_v20  ;;  %v1345_v15 = vpop.eup %1344  ;;  %v1788_v30 = vsel %vm259_vm15, %v260_v40, %v258_v50  ;;  %vm319_vm6 = vcmp.eq.f32.partialorder %v1655_v34, 0.0  ;;  %v411_v31 = vmul.f32 %v1337_v32, %v410_v22 }
  0xae   : > { %1346 = vrsqrt.f32 %v1749_v62  ;;  %v276_v4 = vmul.f32 %v1341_v57, %v275_v10  ;;  %vm283_vm7 = vcmp.eq.f32.partialorder %v1699_v19, 0.0  ;;  %v380_v6 = vand.u32 2147483648, %v1701_v20 }
  0xaf   : > { %v372_v36 = vmul.f32 %v1343_v60, %v371_v23  ;;  %v267_v5 = vmul.f32 %v1339_v41, %v266_v25  ;;  %v419_v42 = vmul.f32 %v1345_v15, %v1730_v38  ;;  %v1795_v43 = vmax.f32 %v1719_v33, 1e-12 }
  0xb0   : > { %v277_v26 = vmul.f32 0.5, %v276_v4  ;;  %v306_v9 = vsel %vm305_vm0, %v1642_v17, %v304_v39  ;;  %v316_v40 = vmul.f32 %v315_v21, %v1655_v34  ;;  %v412_v32 = vmul.f32 %v411_v31, %v1657_v35 }
  0xb1   : > { %vm415_vm8 = vcmp.eq.f32.partialorder %v1657_v35, 0.0  ;;  %vm271_vm9 = vcmp.eq.f32.partialorder %v1670_v51, 0.0  ;;  %v373_v41 = vmul.f32 0.5, %v372_v36  ;;  %v420_v46 = vmul.f32 %v1345_v15, %v419_v42 }
  0xb2   : > { %v278_v28 = vsub.f32 1.5, %v277_v26  ;;  %v1806_v33 = vmax.f32 %v1714_v27, 1e-12  ;;  %v268_v56 = vmul.f32 %v267_v5, %v1670_v51  ;;  %vm425_vm10 = vcmp.eq.f32.partialorder %v1730_v38, inf }
  0xb3   : > { %v374_v58 = vsub.f32 1.5, %v373_v41  ;;  %1348 = vrcp.f32 %v1795_v43  ;;  %vm377_vm11 = vcmp.eq.f32.partialorder %v1701_v20, inf  ;;  %v421_v61 = vmul.f32 0.5, %v420_v46 }
  0xb4   : > { %v1347_v44 = vpop.eup %1346  ;;  %v279_v45 = vmul.f32 %v1341_v57, %v278_v28  ;;  %vm427_vm12 = vcmp.eq.f32.partialorder %v1730_v38, 0.0  ;;  %v428_v57 = vand.u32 2147483648, %v1730_v38  ;;  %v1819_v27 = vsel %vm307_vm1, %v308_v37, %v306_v9 }
  0xb5   : > { %v323_v52 = vmul.f32 %v1347_v44, %v1749_v62  ;;  %v318_v63 = vsel %vm317_vm2, %v1655_v34, %v316_v40  ;;  %v375_v10 = vmul.f32 %v1343_v60, %v374_v58  ;;  %v414_v3 = vsel %vm413_vm3, %v1657_v35, %v412_v32 }
  0xb6   : > { %v280_v59 = vmul.f32 %v279_v45, %v1699_v19  ;;  %v422_v54 = vsub.f32 1.5, %v421_v61  ;;  %vm329_vm13 = vcmp.eq.f32.partialorder %v1749_v62, inf  ;;  %1350 = vrcp.f32 %v1806_v33 }
  0xb7   : > { %v324_v11 = vmul.f32 %v1347_v44, %v323_v52  ;;  %v270_v17 = vsel %vm269_vm5, %v1670_v51, %v268_v56  ;;  %v455_v60 = vand.u32 2147483647, %v1795_v43  ;;  %v457_v4 = vand.u32 2147483648, %v1795_v43 }
  0xb8   : > { %v282_v50 = vsel %vm281_vm4, %v1699_v19, %v280_v59  ;;  %v1841_v39 = vsel %vm319_vm6, %v320_v53, %v318_v63  ;;  %v423_v22 = vmul.f32 %v1345_v15, %v422_v54  ;;  %vm331_vm14 = vcmp.eq.f32.partialorder %v1749_v62, 0.0 }
  0xb9   : > { %v325_v37 = vmul.f32 0.5, %v324_v11  ;;  %v285_v21 = vsel %vm283_vm7, %v284_v29, %v282_v50  ;;  %v1847_v23 = vmax.f32 %v1759_v47, 1e-12  ;;  %v1349_v25 = vpop.eup %1348  ;;  %v376_v26 = vmul.f32 %v375_v10, %v1701_v20 }
  0xba   : > { %vm379_vm15 = vcmp.eq.f32.partialorder %v1701_v20, 0.0  ;;  %v332_v36 = vand.u32 2147483648, %v1749_v62  ;;  %vm451_vm0 = vweird.f32 %v1795_v43  ;;  %v1857_v34 = vsel %vm415_vm8, %v416_v18, %v414_v3 }
  0xbb   : > { %v326_v31 = vsub.f32 1.5, %v325_v37  ;;  %v1863_v19 = vsel %vm271_vm9, %v272_v55, %v270_v17  ;;  %v424_v53 = vmul.f32 %v423_v22, %v1730_v38  ;;  %v447_v47 = vmul.f32 %v1349_v25, %v1795_v43 }
  0xbc   : > { %v1867_v29 = vmax.f32 %v285_v21, 1e-12  ;;  %vm1869_vm1 = vcmp.eq.f32.partialorder %v455_v60, 8.507059e+37  ;;  %v458_v35 = vor.u32 1.1754944e-38, %v457_v4  ;;  %v1351_v18 = vpop.eup %1350  ;;  %vm571_vm2 = vweird.f32 %v1806_v33 }
  0xbd   : > { %v327_v15 = vmul.f32 %v1347_v44, %v326_v31  ;;  %v426_v28 = vsel %vm425_vm10, %v1730_v38, %v424_v53  ;;  %v448_v51 = vsub.f32 1.0, %v447_v47  ;;  %1352 = vrcp.f32 %v1847_v23 }
  0xbe   : > { %v378_v55 = vsel %vm377_vm11, %v1701_v20, %v376_v26  ;;  %v429_v42 = vsel %vm427_vm12, %v428_v57, %v426_v28  ;;  %v567_v9 = vmul.f32 %v1351_v18, %v1806_v33  ;;  %vm452_vm3 = vweird.f32 %v1349_v25 }
  0xbf   : > { %v328_v44 = vmul.f32 %v327_v15, %v1749_v62  ;;  %v449_v40 = vmul.f32 %v1349_v25, %v448_v51  ;;  %v575_v32 = vand.u32 2147483647, %v1806_v33  ;;  %v577_v41 = vand.u32 2147483648, %v1806_v33  ;;  %vm453_vm5 = vmor %vm451_vm0, %vm452_vm3 }
  0xc0   : > { %1354 = vrcp.f32 %v1867_v29  ;;  %v568_v46 = vsub.f32 1.0, %v567_v9  ;;  %v1892_v38 = vmax.f32 %v1690_v16, 1e-12  ;;  %v1894_v52 = vmax.f32 %v429_v42, 1e-12 }
  0xc1   : > { %v330_v45 = vsel %vm329_vm13, %v1749_v62, %v328_v44  ;;  %v450_v56 = vadd.f32 %v1349_v25, %v449_v40  ;;  %vm572_vm4 = vweird.f32 %v1351_v18  ;;  %v515_v58 = vand.u32 2147483647, %v1847_v23 }
  0xc2   : > { %v333_v59 = vsel %vm331_vm14, %v332_v36, %v330_v45  ;;  %v569_v61 = vmul.f32 %v1351_v18, %v568_v46  ;;  %1356 = vrcp.f32 %v1892_v38  ;;  %v1903_v57 = vmax.f32 %v1755_v49, 1e-12  ;;  %vm573_vm8 = vmor %vm571_vm2, %vm572_vm4 }
  0xc3   : > { %v1353_v16 = vpop.eup %1352  ;;  %v1909_v63 = vsel %vm379_vm15, %v380_v6, %v378_v55  ;;  %v454_v10 = vsel %vm453_vm5, %v1349_v25, %v450_v56  ;;  %vm1911_vm6 = vcmp.eq.f32.partialorder %v575_v32, 8.507059e+37  ;;  %v578_v43 = vor.u32 1.1754944e-38, %v577_v41 }
  0xc4   : > { %v459_v11 = vsel %vm1869_vm1, %v458_v35, %v454_v10  ;;  %v570_v3 = vadd.f32 %v1351_v18, %v569_v61  ;;  %v507_v49 = vmul.f32 %v1353_v16, %v1847_v23  ;;  %vm511_vm7 = vweird.f32 %v1847_v23 }
  0xc5   : > { %1358 = vrcp.f32 %v1894_v52  ;;  %v1920_v50 = vmax.f32 %v333_v59, 1e-12  ;;  %v460_v20 = vmul.f32 %v459_v11, %v1510_v2  ;;  %v517_v6 = vand.u32 2147483648, %v1847_v23 }
  0xc6   : > { %v1927_v54 = vpop.eup %1354  ;;  %v574_v17 = vsel %vm573_vm8, %v1351_v18, %v570_v3  ;;  %v508_v37 = vsub.f32 1.0, %v507_v49  ;;  %vm1929_vm9 = vcmp.eq.f32.partialorder %v515_v58, 8.507059e+37  ;;  %1360 = vrcp.f32 %v1903_v57 }
  0xc7   : > { %718 = vmatmul.f32.vlgmr.msra.gmra.mxu0 %v460_v20  ;;  %v579_v2 = vsel %vm1911_vm6, %v578_v43, %v574_v17  ;;  %v590_v4 = vand.u32 2147483647, %v1892_v38  ;;  %v592_v33 = vand.u32 2147483648, %v1892_v38  ;;  %v1939_v21 = vmax.f32 %v1788_v30, 1e-12 }
  0xc8   : > { %v1357_v22 = vpop.eup %1356  ;;  %v580_v25 = vmul.f32 %v579_v2, %v1507_v1  ;;  %v509_v26 = vmul.f32 %v1353_v16, %v508_v37  ;;  %vm512_vm10 = vweird.f32 %v1353_v16  ;;  %v1943_v31 = vmax.f32 %v1819_v27, 1e-12 }
  0xc9   : > { %1362 = vrcp.f32 %v1920_v50  ;;  %v518_v36 = vor.u32 1.1754944e-38, %v517_v6  ;;  %v582_v53 = vmul.f32 %v1357_v22, %v1892_v38  ;;  %v635_v47 = vand.u32 2147483647, %v1903_v57  ;;  %vm513_vm12 = vmor %vm511_vm7, %vm512_vm10 }
  0xca   : > { %742 = vmatmul.f32.vlgmr.msra.gmra.mxu2 %v580_v25  ;;  %v510_v15 = vadd.f32 %v1353_v16, %v509_v26  ;;  %vm586_vm11 = vweird.f32 %v1892_v38  ;;  %v637_v30 = vand.u32 2147483648, %v1903_v57  ;;  %1364 = vrcp.f32 %v1939_v21 }
  0xcb   : > { %v1951_v1 = vpop.eup %1358  ;;  %v583_v27 = vsub.f32 1.0, %v582_v53  ;;  %vm1955_vm13 = vcmp.eq.f32.partialorder %v590_v4, 8.507059e+37  ;;  %1366 = vrcp.f32 %v1943_v31  ;;  %v1961_v35 = vmax.f32 %v1782_v24, 1e-12 }
  0xcc   : > { %v1361_v18 = vpop.eup %1360  ;;  %v514_v28 = vsel %vm513_vm12, %v1353_v16, %v510_v15  ;;  %vm587_vm14 = vweird.f32 %v1357_v22  ;;  %v593_v51 = vor.u32 1.1754944e-38, %v592_v33  ;;  %vm631_vm15 = vweird.f32 %v1903_v57 }
  0xcd   : > { %v519_v23 = vsel %vm1929_vm9, %v518_v36, %v514_v28  ;;  %v584_v55 = vmul.f32 %v1357_v22, %v583_v27  ;;  %v627_v42 = vmul.f32 %v1361_v18, %v1903_v57  ;;  %vm1967_vm0 = vcmp.eq.f32.partialorder %v635_v47, 8.507059e+37  ;;  %vm588_vm1 = vmor %vm586_vm11, %vm587_vm14 }
  0xce   : > { %v520_v9 = vmul.f32 %v519_v23, %v1523_v8  ;;  %v638_v24 = vor.u32 1.1754944e-38, %v637_v30  ;;  %v470_v40 = vand.u32 2147483647, %v1939_v21  ;;  %v472_v32 = vand.u32 2147483648, %v1939_v21 }
  0xcf   : > { %v1974_v41 = vpop.eup %1362  ;;  %v585_v45 = vadd.f32 %v1357_v22, %v584_v55  ;;  %v628_v46 = vsub.f32 1.0, %v627_v42  ;;  %v530_v56 = vand.u32 2147483647, %v1943_v31  ;;  %1368 = vrcp.f32 %v1961_v35 }
  0xd0   : > { %v1365_v58 = vpop.eup %1364  ;;  %730 = vmatmul.f32.vlgmr.msra.gmra.mxu1 %v520_v9  ;;  %vm466_vm2 = vweird.f32 %v1939_v21  ;;  %vm526_vm3 = vweird.f32 %v1943_v31  ;;  %v532_v8 = vand.u32 2147483648, %v1943_v31  ;;  %v1985_v59 = vmax.f32 %v1742_v48, 1e-12 }
  0xd1   : > { %v1367_v61 = vpop.eup %1366  ;;  %v589_v16 = vsel %vm588_vm1, %v1357_v22, %v585_v45  ;;  %v629_v10 = vmul.f32 %v1361_v18, %v628_v46  ;;  %vm632_vm4 = vweird.f32 %v1361_v18  ;;  %v462_v62 = vmul.f32 %v1365_v58, %v1939_v21 }
  0xd2   : > { %v594_v43 = vsel %vm1955_vm13, %v593_v51, %v589_v16  ;;  %vm1990_vm5 = vcmp.eq.f32.partialorder %v470_v40, 8.507059e+37  ;;  %v473_v11 = vor.u32 1.1754944e-38, %v472_v32  ;;  %v522_v3 = vmul.f32 %v1367_v61, %v1943_v31  ;;  %vm633_vm7 = vmor %vm631_vm15, %vm632_vm4 }
  0xd3   : > { %v595_v49 = vmul.f32 %v594_v43, %v1504_v0  ;;  %v630_v48 = vadd.f32 %v1361_v18, %v629_v10  ;;  %v463_v20 = vsub.f32 1.0, %v462_v62  ;;  %vm1996_vm6 = vcmp.eq.f32.partialorder %v530_v56, 8.507059e+37 }
  0xd4   : > { %v523_v17 = vsub.f32 1.0, %v522_v3  ;;  %v533_v37 = vor.u32 1.1754944e-38, %v532_v8  ;;  %v605_v60 = vand.u32 2147483647, %v1961_v35  ;;  %1370 = vrcp.f32 %v1985_v59 }
  0xd5   : > { %v1369_v2 = vpop.eup %1368  ;;  %745 = vmatmul.f32.gmra.mxu2 %v595_v49  ;;  %v634_v4 = vsel %vm633_vm7, %v1361_v18, %v630_v48  ;;  %v464_v33 = vmul.f32 %v1365_v58, %v463_v20  ;;  %vm467_vm8 = vweird.f32 %v1365_v58  ;;  %v2005_v0 = vmax.f32 %v1863_v19, 1e-12 }
  0xd6   : > { %v639_v22 = vsel %vm1967_vm0, %v638_v24, %v634_v4  ;;  %v524_v25 = vmul.f32 %v1367_v61, %v523_v17  ;;  %vm527_vm9 = vweird.f32 %v1367_v61  ;;  %v597_v57 = vmul.f32 %v1369_v2, %v1961_v35  ;;  %vm468_vm11 = vmor %vm466_vm2, %vm467_vm8 }
  0xd7   : > { %v640_v26 = vmul.f32 %v639_v22, %v1520_v7  ;;  %v465_v36 = vadd.f32 %v1365_v58, %v464_v33  ;;  %vm601_vm10 = vweird.f32 %v1961_v35  ;;  %v607_v53 = vand.u32 2147483648, %v1961_v35  ;;  %vm528_vm13 = vmor %vm526_vm3, %vm527_vm9 }
  0xd8   : > { %v525_v47 = vadd.f32 %v1367_v61, %v524_v25  ;;  %v598_v19 = vsub.f32 1.0, %v597_v57  ;;  %vm2015_vm12 = vcmp.eq.f32.partialorder %v605_v60, 8.507059e+37  ;;  %1372 = vrcp.f32 %v2005_v0 }
  0xd9   : > { %754 = vmatmul.f32.vlgmr.msra.gmra.mxu3 %v640_v26  ;;  %v469_v30 = vsel %vm468_vm11, %v1365_v58, %v465_v36  ;;  %vm602_vm14 = vweird.f32 %v1369_v2  ;;  %v650_v7 = vand.u32 2147483647, %v1985_v59  ;;  %v2024_v27 = vmax.f32 %v1841_v39, 1e-12 }
  0xda   : > { %v1371_v21 = vpop.eup %1370  ;;  %v474_v5 = vsel %vm1990_vm5, %v473_v11, %v469_v30  ;;  %v529_v18 = vsel %vm528_vm13, %v1367_v61, %v525_v47  ;;  %v599_v28 = vmul.f32 %v1369_v2, %v598_v19  ;;  %v2029_v51 = vmax.f32 %v1857_v34, 1e-12  ;;  %vm603_vm0 = vmor %vm601_vm10, %vm602_vm14 }
  0xdb   : > { %v475_v23 = vmul.f32 %v474_v5, %v1533_v13  ;;  %v534_v31 = vsel %vm1996_vm6, %v533_v37, %v529_v18  ;;  %v608_v55 = vor.u32 1.1754944e-38, %v607_v53  ;;  %v642_v42 = vmul.f32 %v1371_v21, %v1985_v59 }
  0xdc   : > { %v535_v39 = vmul.f32 %v534_v31, %v1536_v14  ;;  %v600_v44 = vadd.f32 %v1369_v2, %v599_v28  ;;  %vm646_vm15 = vweird.f32 %v1985_v59  ;;  %v652_v9 = vand.u32 2147483648, %v1985_v59 }
  0xdd   : > { %721 = vmatmul.f32.gmra.mxu0 %v475_v23  ;;  %v643_v34 = vsub.f32 1.0, %v642_v42  ;;  %vm2041_vm1 = vcmp.eq.f32.partialorder %v650_v7, 8.507059e+37  ;;  %v485_v24 = vand.u32 2147483647, %v2005_v0  ;;  %1374 = vrcp.f32 %v2024_v27 }
  0xde   : > { %v1373_v14 = vpop.eup %1372  ;;  %733 = vmatmul.f32.gmra.mxu1 %v535_v39  ;;  %v604_v40 = vsel %vm603_vm0, %v1369_v2, %v600_v44  ;;  %v487_v32 = vand.u32 2147483648, %v2005_v0  ;;  %v547_v45 = vand.u32 2147483648, %v2024_v27  ;;  %1376 = vrcp.f32 %v2029_v51  ;;  %v1448_v2 = vld [vmem:[%s1501_s18 + $0x68] sm:$0xff] }
  0xdf   : > { %v609_v35 = vsel %vm2015_vm12, %v608_v55, %v604_v40  ;;  %v644_v46 = vmul.f32 %v1371_v21, %v643_v34  ;;  %vm647_vm2 = vweird.f32 %v1371_v21  ;;  %v477_v56 = vmul.f32 %v1373_v14, %v2005_v0 }
  0xe0   : > { %v610_v58 = vmul.f32 %v609_v35, %v1530_v12  ;;  %v653_v8 = vor.u32 1.1754944e-38, %v652_v9  ;;  %vm481_vm3 = vweird.f32 %v2005_v0  ;;  %v545_v61 = vand.u32 2147483647, %v2024_v27  ;;  %vm648_vm6 = vmor %vm646_vm15, %vm647_vm2  ;;  %v1451_v35 = vld [vmem:[%s1501_s18 + $0x70] sm:$0xff] }
  0xe1   : > { %vm496_vm4 = vweird.f32 %v1867_v29  ;;  %v645_v16 = vadd.f32 %v1371_v21, %v644_v46  ;;  %v478_v10 = vsub.f32 1.0, %v477_v56  ;;  %vm2057_vm5 = vcmp.eq.f32.partialorder %v485_v24, 8.507059e+37  ;;  %v1452_v56 = vld [vmem:[%s1501_s18 + $0x18] sm:$0xff] }
  0xe2   : > { %v492_v43 = vmul.f32 %v1927_v54, %v1867_v29  ;;  %748 = vmatmul.f32.gmra.mxu2 %v610_v58  ;;  %vm482_vm7 = vweird.f32 %v1373_v14  ;;  %v488_v12 = vor.u32 1.1754944e-38, %v487_v32  ;;  %vm541_vm8 = vweird.f32 %v2024_v27 }
  0xe3   : > { %v548_v38 = vor.u32 1.1754944e-38, %v547_v45  ;;  %v1375_v11 = vpop.eup %1374  ;;  %v649_v3 = vsel %vm648_vm6, %v1371_v21, %v645_v16  ;;  %v479_v49 = vmul.f32 %v1373_v14, %v478_v10  ;;  %vm661_vm9 = vweird.f32 %v2029_v51  ;;  %vm483_vm12 = vmor %vm481_vm3, %vm482_vm7  ;;  %v1449_v21 = vld [vmem:[%s1501_s18 + $0x10] sm:$0xff] }
  0xe4   : > { %v665_v48 = vand.u32 2147483647, %v2029_v51  ;;  %v493_v20 = vsub.f32 1.0, %v492_v43  ;;  %v1377_v6 = vpop.eup %1376  ;;  %v654_v17 = vsel %vm2041_vm1, %v653_v8, %v649_v3  ;;  %v537_v59 = vmul.f32 %v1375_v11, %v2024_v27 }
  0xe5   : > { %vm2071_vm10 = vcmp.eq.f32.partialorder %v545_v61, 8.507059e+37  ;;  %v667_v60 = vand.u32 2147483648, %v2029_v51  ;;  %vm497_vm11 = vweird.f32 %v1927_v54  ;;  %v655_v4 = vmul.f32 %v1448_v2, %v654_v17 }
  0xe6   : > { %v480_v33 = vadd.f32 %v1373_v14, %v479_v49  ;;  %v657_v22 = vmul.f32 %v1377_v6, %v2029_v51  ;;  %v500_v25 = vand.u32 2147483647, %v1867_v29  ;;  %v538_v57 = vsub.f32 1.0, %v537_v59  ;;  %vm498_vm0 = vmor %vm496_vm4, %vm497_vm11 }
  0xe7   : > { %v494_v26 = vmul.f32 %v1927_v54, %v493_v20  ;;  %v502_v36 = vand.u32 2147483648, %v1867_v29  ;;  %v2086_v53 = vmax.f32 %v1909_v63, 1e-12  ;;  %757 = vmatmul.f32.gmra.mxu3 %v655_v4  ;;  %vm542_vm13 = vweird.f32 %v1375_v11  ;;  %v1453_v20 = vld [vmem:[%s1501_s18 + $0x78] sm:$0xff] }
  0xe8   : > { %v484_v47 = vsel %vm483_vm12, %v1373_v14, %v480_v33  ;;  %v658_v19 = vsub.f32 1.0, %v657_v22  ;;  %v672_v15 = vmul.f32 %v1951_v1, %v1894_v52  ;;  %v539_v0 = vmul.f32 %v1375_v11, %v538_v57  ;;  %vm543_vm1 = vmor %vm541_vm8, %vm542_vm13  ;;  %v1450_v14 = vld [vmem:[%s1501_s18 + $0x30] sm:$0xff]  ;;  %v1454_v33 = vld [vmem:[%s1501_s18 + $0x38] sm:$0xff] }
  0xe9   : > { %v489_v30 = vsel %vm2057_vm5, %v488_v12, %v484_v47  ;;  %v495_v7 = vadd.f32 %v1927_v54, %v494_v26  ;;  %1378 = vrcp.f32 %v2086_v53  ;;  %vm662_vm14 = vweird.f32 %v1377_v6  ;;  %v1071_v57 = vld [vmem:[%s2377_s2] sm:$0x1] }
  0xea   : > { %v490_v5 = vmul.f32 %v1449_v21, %v489_v30  ;;  %v659_v18 = vmul.f32 %v1377_v6, %v658_v19  ;;  %vm2095_vm15 = vcmp.eq.f32.partialorder %v665_v48, 8.507059e+37  ;;  %v540_v28 = vadd.f32 %v1375_v11, %v539_v0  ;;  %vm663_vm4 = vmor %vm661_vm9, %vm662_vm14 }
  0xeb   : > { %v499_v23 = vsel %vm498_vm0, %v1927_v54, %v495_v7  ;;  %v503_v31 = vor.u32 1.1754944e-38, %v502_v36  ;;  %v673_v55 = vsub.f32 1.0, %v672_v15  ;;  %v668_v39 = vor.u32 1.1754944e-38, %v667_v60 }
  0xec   : > { %724 = vmatmul.f32.gmra.mxu0 %v490_v5  ;;  %v660_v42 = vadd.f32 %v1377_v6, %v659_v18  ;;  %vm501_vm2 = vcmp.eq.f32.partialorder %v500_v25, 8.507059e+37  ;;  %vm676_vm3 = vweird.f32 %v1894_v52  ;;  %v544_v44 = vsel %vm543_vm1, %v1375_v11, %v540_v28 }
  0xed   : > { %v504_v29 = vsel %vm501_vm2, %v503_v31, %v499_v23  ;;  %v674_v54 = vmul.f32 %v1951_v1, %v673_v55  ;;  %vm677_vm5 = vweird.f32 %v1951_v1  ;;  %v549_v27 = vsel %vm2071_vm10, %v548_v38, %v544_v44 }
  0xee   : > { %v664_v9 = vsel %vm663_vm4, %v1377_v6, %v660_v42  ;;  %v680_v34 = vand.u32 2147483647, %v1894_v52  ;;  %v682_v13 = vand.u32 2147483648, %v1894_v52  ;;  %v550_v40 = vmul.f32 %v1450_v14, %v549_v27  ;;  %vm678_vm6 = vmor %vm676_vm3, %vm677_vm5 }
  0xef   : > { %v1379_v24 = vpop.eup %1378  ;;  %v669_v51 = vsel %vm2095_vm15, %v668_v39, %v664_v9  ;;  %v675_v32 = vadd.f32 %v1951_v1, %v674_v54  ;;  %v552_v45 = vmul.f32 %v1974_v41, %v1920_v50  ;;  %v505_v58 = vmul.f32 %v1452_v56, %v504_v29 }
  0xf0   : > { %v670_v46 = vmul.f32 %v1451_v35, %v669_v51  ;;  %v612_v8 = vmul.f32 %v1379_v24, %v2086_v53  ;;  %736 = vmatmul.f32.gmra.mxu1 %v550_v40  ;;  %v683_v16 = vor.u32 1.1754944e-38, %v682_v13  ;;  %v622_v43 = vand.u32 2147483648, %v2086_v53 }
  0xf1   : > { %v679_v61 = vsel %vm678_vm6, %v1951_v1, %v675_v32  ;;  %v553_v10 = vsub.f32 1.0, %v552_v45  ;;  %vm681_vm7 = vcmp.eq.f32.partialorder %v680_v34, 8.507059e+37  ;;  %v562_v12 = vand.u32 2147483648, %v1920_v50 }
  0xf2   : > { %760 = vmatmul.f32.gmra.mxu3 %v670_v46  ;;  %v613_v62 = vsub.f32 1.0, %v612_v8  ;;  %v684_v38 = vsel %vm681_vm7, %v683_v16, %v679_v61  ;;  %vm557_vm8 = vweird.f32 %v1974_v41  ;;  %v560_v52 = vand.u32 2147483647, %v1920_v50 }
  0xf3   : > { %v554_v11 = vmul.f32 %v1974_v41, %v553_v10  ;;  %vm617_vm9 = vweird.f32 %v1379_v24  ;;  %v620_v1 = vand.u32 2147483647, %v2086_v53  ;;  %vm556_vm10 = vweird.f32 %v1920_v50  ;;  %v1455_v50 = vld [vmem:[%s1501_s18 + $0x58] sm:$0xff] }
  0xf4   : > { %727 = vmatmul.f32.gmra.mxu0 %v505_v58  ;;  %v614_v3 = vmul.f32 %v1379_v24, %v613_v62  ;;  %vm616_vm11 = vweird.f32 %v2086_v53  ;;  %v685_v6 = vmul.f32 %v1453_v20, %v684_v38  ;;  %vm558_vm12 = vmor %vm556_vm10, %vm557_vm8  ;;  %v563_v17 = vor.u32 1.1754944e-38, %v562_v12 }
  0xf5   : > { %v555_v49 = vadd.f32 %v1974_v41, %v554_v11  ;;  %vm618_vm13 = vmor %vm616_vm11, %vm617_vm9  ;;  %v623_v59 = vor.u32 1.1754944e-38, %v622_v43  ;;  %vm561_vm14 = vcmp.eq.f32.partialorder %v560_v52, 8.507059e+37  ;;  %vm621_vm15 = vcmp.eq.f32.partialorder %v620_v1, 8.507059e+37 }
  0xf6   : > { %v615_v48 = vadd.f32 %v1379_v24, %v614_v3  ;;  %v1240_v26 = vmul.f32 -1.442695, %v1071_v57  ;;  %vm1142_vm8 = vcmask 64512  }
  0xf7   : > { %v559_v37 = vsel %vm558_vm12, %v1974_v41, %v555_v49  ;;  %v1464_v49 = vmov 0.0  }
  0xf8   : > { %v619_v60 = vsel %vm618_vm13, %v1379_v24, %v615_v48  ;;  %v564_v2 = vsel %vm561_vm14, %v563_v17, %v559_v37  ;;  %1380 = vpow2.f32 %v1240_v26 }
  0xf9   : > { %v624_v4 = vsel %vm621_vm15, %v623_v59, %v619_v60  ;;  %v565_v22 = vmul.f32 %v1454_v33, %v564_v2 }
  0xfa   : > { %v625_v25 = vmul.f32 %v1455_v50, %v624_v4  ;;  %763 = vmatmul.f32.gmra.mxu3 %v685_v6 }
  0xfb   : > { %739 = vmatmul.f32.gmra.mxu1 %v565_v22 }
  0xfc   : > { %751 = vmatmul.f32.gmra.mxu2 %v625_v25 }
  0xfe   : > { %v1381_v41 = vpop.eup %1380 }
  0xff   : > { %v1075_v47 = vadd.f32 1.0, %v1381_v41 }
 0x101   : > { %vm1081_vm0 = vweird.f32 %v1075_v47  ;;  %v1087_v28 = vand.u32 2147483648, %v1075_v47  ;;  %v1085_v31 = vand.u32 2147483647, %v1075_v47 }
 0x103   : > { %v1088_v44 = vor.u32 1.1754944e-38, %v1087_v28  ;;  %vm1086_vm3 = vcmp.eq.f32.partialorder %v1085_v31, 8.507059e+37 }
 0x144   : > { %v719_v36 = vpop.f32.mrf.mxu0 }
 0x145   : > { %v1224_v53 = vmul.f32 -1.442695, %v719_v36 }
 0x147   : > { %1382 = vpow2.f32 %v1224_v53 }
 0x148   : > { %1384 = vrcp.f32 %v1075_v47 }
 0x14d   : > { %v1383_v19 = vpop.eup %1382  ;;  %v743_v15 = vpop.f32.mrf.mxu2 }
 0x14e   : > { %v731_v30 = vpop.f32.mrf.mxu1  ;;  %v1385_v0 = vpop.eup %1384  ;;  %v815_v7 = vadd.f32 1.0, %v1383_v19  ;;  %v1232_v21 = vmul.f32 -1.442695, %v743_v15 }
 0x14f   : > { %v1228_v5 = vmul.f32 -1.442695, %v731_v30  ;;  %v1077_v18 = vmul.f32 %v1385_v0, %v1075_v47  ;;  %vm1082_vm1 = vweird.f32 %v1385_v0 }
 0x150   : > { %1386 = vrcp.f32 %v815_v7  ;;  %vm2146_vm2 = vmor %vm1081_vm0, %vm1082_vm1  ;;  %v842_v51 = vand.u32 2147483648, %v815_v7  ;;  %v840_v46 = vand.u32 2147483647, %v815_v7  ;;  %vm836_vm5 = vweird.f32 %v815_v7 }
 0x151   : > { %v1078_v63 = vsub.f32 1.0, %v1077_v18  ;;  %1388 = vpow2.f32 %v1232_v21 }
 0x152   : > { %1390 = vpow2.f32 %v1228_v5  ;;  %v843_v62 = vor.u32 1.1754944e-38, %v842_v51  ;;  %vm841_vm7 = vcmp.eq.f32.partialorder %v840_v46, 8.507059e+37 }
 0x153   : > { %v1079_v23 = vmul.f32 %v1385_v0, %v1078_v63 }
 0x155   : > { %v1080_v42 = vadd.f32 %v1385_v0, %v1079_v23 }
 0x156   : > { %v1387_v39 = vpop.eup %1386 }
 0x157   : > { %v1389_v29 = vpop.eup %1388  ;;  %v832_v54 = vmul.f32 %v1387_v39, %v815_v7  ;;  %v1084_v27 = vsel %vm2146_vm2, %v1385_v0, %v1080_v42  ;;  %vm837_vm4 = vweird.f32 %v1387_v39 }
 0x158   : > { %v1391_v9 = vpop.eup %1390  ;;  %v2152_v34 = vadd.f32 1.0, %v1389_v29  ;;  %v746_v13 = vpop.f32.mrf.mxu2  ;;  %v1089_v32 = vsel %vm1086_vm3, %v1088_v44, %v1084_v27  ;;  %vm838_vm6 = vmor %vm836_vm5, %vm837_vm4 }
 0x159   : > { %v833_v24 = vsub.f32 1.0, %v832_v54  ;;  %v2154_v14 = vadd.f32 1.0, %v1391_v9  ;;  %v1233_v40 = vmul.f32 -1.442695, %v746_v13  ;;  %v2158_v8 = vperm.slane %v1089_v32, 0 }
 0x15a   : > { %1392 = vrcp.f32 %v2152_v34  ;;  %v722_v45 = vpop.f32.mrf.mxu0  ;;  %v960_v17 = vand.u32 2147483647, %v2152_v34  ;;  %vm956_vm10 = vweird.f32 %v2152_v34  ;;  %v962_v37 = vand.u32 2147483648, %v2152_v34 }
 0x15b   : > { %v834_v35 = vmul.f32 %v1387_v39, %v833_v24  ;;  %1394 = vrcp.f32 %v2154_v14  ;;  %v1225_v16 = vmul.f32 -1.442695, %v722_v45  ;;  %v734_v10 = vpop.f32.mrf.mxu1  ;;  %v902_v33 = vand.u32 2147483648, %v2154_v14 }
 0x15c   : > { %1396 = vpow2.f32 %v1233_v40  ;;  %v755_v56 = vpop.f32.mrf.mxu3  ;;  %v1229_v11 = vmul.f32 -1.442695, %v734_v10  ;;  %v900_v25 = vand.u32 2147483647, %v2154_v14  ;;  %vm961_vm13 = vcmp.eq.f32.partialorder %v960_v17, 8.507059e+37 }
 0x15d   : > { %v835_v58 = vadd.f32 %v1387_v39, %v834_v35  ;;  %v1236_v61 = vmul.f32 -1.442695, %v755_v56  ;;  %vm896_vm14 = vweird.f32 %v2154_v14  ;;  %v963_v53 = vor.u32 1.1754944e-38, %v962_v37 }
 0x15e   : > { %v903_v30 = vor.u32 1.1754944e-38, %v902_v33  ;;  %vm901_vm1 = vcmp.eq.f32.partialorder %v900_v25, 8.507059e+37 }
 0x15f   : > { %v839_v43 = vsel %vm838_vm6, %v1387_v39, %v835_v58  ;;  %1398 = vpow2.f32 %v1236_v61 }
 0x160   : > { %v1393_v12 = vpop.eup %1392  ;;  %v844_v38 = vsel %vm841_vm7, %v843_v62, %v839_v43  ;;  %1400 = vpow2.f32 %v1225_v16 }
 0x161   : > { %v1395_v52 = vpop.eup %1394  ;;  %vm1094_vm9 = vcmp.gt.f32.partialorder %v844_v38, %v2158_v8  ;;  %v952_v3 = vmul.f32 %v1393_v12, %v2152_v34  ;;  %1402 = vpow2.f32 %v1229_v11  ;;  %vm957_vm11 = vweird.f32 %v1393_v12 }
 0x162   : > { %v1397_v1 = vpop.eup %1396  ;;  %v1241_v48 = vsel %vm1094_vm9, 1.0, %v1464_v49  ;;  %v892_v20 = vmul.f32 %v1395_v52, %v2154_v14  ;;  %vm897_vm12 = vweird.f32 %v1395_v52  ;;  %vm958_vm15 = vmor %vm956_vm10, %vm957_vm11 }
 0x163   : > { %1143 = vst.msk [vmem:[%s2165_s4] sm:$0xff] %vm1142_vm8, %v1241_v48  ;;  %v953_v6 = vsub.f32 1.0, %v952_v3  ;;  %v2174_v59 = vadd.f32 1.0, %v1397_v1  ;;  %vm898_vm0 = vmor %vm896_vm14, %vm897_vm12 }
 0x164   : > { %v893_v60 = vsub.f32 1.0, %v892_v20 }
 0x165   : > { %v1399_v2 = vpop.eup %1398  ;;  %v954_v4 = vmul.f32 %v1393_v12, %v953_v6  ;;  %1404 = vrcp.f32 %v2174_v59  ;;  %v749_v41 = vpop.f32.mrf.mxu2  ;;  %v975_v19 = vand.u32 2147483647, %v2174_v59  ;;  %v977_v0 = vand.u32 2147483648, %v2174_v59 }
 0x166   : > { %v1401_v22 = vpop.eup %1400  ;;  %v894_v50 = vmul.f32 %v1395_v52, %v893_v60  ;;  %v2181_v57 = vadd.f32 1.0, %v1399_v2  ;;  %v1234_v18 = vmul.f32 -1.442695, %v749_v41  ;;  %vm971_vm3 = vweird.f32 %v2174_v59 }
 0x167   : > { %v955_v26 = vadd.f32 %v1393_v12, %v954_v4  ;;  %v2184_v36 = vadd.f32 1.0, %v1401_v22  ;;  %v1403_v7 = vpop.eup %1402  ;;  %vm2197_vm5 = vcmp.eq.f32.partialorder %v975_v19, 8.507059e+37  ;;  %v978_v29 = vor.u32 1.1754944e-38, %v977_v0 }
 0x168   : > { %v895_v47 = vadd.f32 %v1395_v52, %v894_v50  ;;  %1406 = vrcp.f32 %v2181_v57  ;;  %v1020_v54 = vand.u32 2147483647, %v2181_v57  ;;  %v2205_v27 = vadd.f32 1.0, %v1403_v7 }
 0x169   : > { %v959_v15 = vsel %vm958_vm15, %v1393_v12, %v955_v26  ;;  %1408 = vrcp.f32 %v2184_v36  ;;  %v725_v39 = vpop.f32.mrf.mxu0  ;;  %vm1016_vm6 = vweird.f32 %v2181_v57  ;;  %v1022_v40 = vand.u32 2147483648, %v2181_v57 }
 0x16a   : > { %v964_v21 = vsel %vm961_vm13, %v963_v53, %v959_v15  ;;  %v899_v5 = vsel %vm898_vm0, %v1395_v52, %v895_v47  ;;  %v758_v23 = vpop.f32.mrf.mxu3  ;;  %1410 = vpow2.f32 %v1234_v18  ;;  %v1226_v51 = vmul.f32 -1.442695, %v725_v39 }
 0x16b   : > { %v1405_v63 = vpop.eup %1404  ;;  %vm1102_vm2 = vcmp.gt.f32.partialorder %v964_v21, %v2158_v8  ;;  %v904_v28 = vsel %vm901_vm1, %v903_v30, %v899_v5  ;;  %v1237_v13 = vmul.f32 -1.442695, %v758_v23  ;;  %1412 = vrcp.f32 %v2205_v27 }
 0x16c   : > { %v1249_v31 = vsel %vm1102_vm2, 1.0, %v1464_v49  ;;  %vm1098_vm4 = vcmp.gt.f32.partialorder %v904_v28, %v2158_v8  ;;  %v967_v55 = vmul.f32 %v1405_v63, %v2174_v59  ;;  %vm972_vm7 = vweird.f32 %v1405_v63 }
 0x16d   : > { %1151 = vst.msk [vmem:[%s2165_s4 + $0x40] sm:$0xff] %vm1142_vm8, %v1249_v31  ;;  %v1245_v44 = vsel %vm1098_vm4, 1.0, %v1464_v49  ;;  %v737_v32 = vpop.f32.mrf.mxu1  ;;  %vm851_vm9 = vweird.f32 %v2184_v36  ;;  %vm2215_vm10 = vcmp.eq.f32.partialorder %v1020_v54, 8.507059e+37  ;;  %v855_v58 = vand.u32 2147483647, %v2184_v36  ;;  %vm973_vm11 = vmor %vm971_vm3, %vm972_vm7 }
 0x16e   : > { %v1407_v9 = vpop.eup %1406  ;;  %1147 = vst.msk [vmem:[%s2165_s4 + $0x20] sm:$0xff] %vm1142_vm8, %v1245_v44  ;;  %v968_v34 = vsub.f32 1.0, %v967_v55  ;;  %1414 = vpow2.f32 %v1237_v13  ;;  %v857_v10 = vand.u32 2147483648, %v2184_v36  ;;  %v1230_v62 = vmul.f32 -1.442695, %v737_v32 }
 0x16f   : > { %v1409_v24 = vpop.eup %1408  ;;  %v1012_v14 = vmul.f32 %v1407_v9, %v2181_v57  ;;  %vm1017_vm12 = vweird.f32 %v1407_v9  ;;  %v1023_v12 = vor.u32 1.1754944e-38, %v1022_v40  ;;  %1416 = vpow2.f32 %v1226_v51 }
 0x170   : > { %v969_v45 = vmul.f32 %v1405_v63, %v968_v34  ;;  %v847_v35 = vmul.f32 %v1409_v24, %v2184_v36  ;;  %v1411_v38 = vpop.eup %1410  ;;  %vm852_vm13 = vweird.f32 %v1409_v24  ;;  %1418 = vpow2.f32 %v1230_v62  ;;  %vm1018_vm0 = vmor %vm1016_vm6, %vm1017_vm12 }
 0x171   : > { %v1013_v46 = vsub.f32 1.0, %v1012_v14  ;;  %v1413_v3 = vpop.eup %1412  ;;  %vm2225_vm14 = vcmp.eq.f32.partialorder %v855_v58, 8.507059e+37  ;;  %v2229_v6 = vadd.f32 1.0, %v1411_v38  ;;  %v858_v37 = vor.u32 1.1754944e-38, %v857_v10  ;;  %vm853_vm1 = vmor %vm851_vm9, %vm852_vm13  ;;  %v728_v7 = vpop.f32.mrf.mxu0 }
 0x172   : > { %v970_v61 = vadd.f32 %v1405_v63, %v969_v45  ;;  %v848_v16 = vsub.f32 1.0, %v847_v35  ;;  %v907_v60 = vmul.f32 %v1413_v3, %v2205_v27  ;;  %v915_v22 = vand.u32 2147483647, %v2205_v27 }
 0x173   : > { %v1014_v43 = vmul.f32 %v1407_v9, %v1013_v46  ;;  %1420 = vrcp.f32 %v2229_v6  ;;  %v917_v26 = vand.u32 2147483648, %v2205_v27  ;;  %vm912_vm4 = vweird.f32 %v1413_v3 }
 0x174   : > { %v974_v11 = vsel %vm973_vm11, %v1405_v63, %v970_v61  ;;  %v849_v52 = vmul.f32 %v1409_v24, %v848_v16  ;;  %v1415_v2 = vpop.eup %1414  ;;  %v908_v57 = vsub.f32 1.0, %v907_v60  ;;  %vm916_vm7 = vcmp.eq.f32.partialorder %v915_v22, 8.507059e+37 }
 0x175   : > { %v979_v1 = vsel %vm2197_vm5, %v978_v29, %v974_v11  ;;  %v1015_v48 = vadd.f32 %v1407_v9, %v1014_v43  ;;  %v761_v17 = vpop.f32.mrf.mxu3  ;;  %v1417_v41 = vpop.eup %1416  ;;  %v2250_v53 = vadd.f32 1.0, %v1415_v2  ;;  %vm911_vm5 = vweird.f32 %v2205_v27 }
 0x176   : > { %vm1103_vm15 = vcmp.gt.f32.partialorder %v979_v1, %v2158_v8  ;;  %v850_v59 = vadd.f32 %v1409_v24, %v849_v52  ;;  %v1238_v47 = vmul.f32 -1.442695, %v761_v17  ;;  %v1419_v19 = vpop.eup %1418  ;;  %v909_v30 = vmul.f32 %v1413_v3, %v908_v57  ;;  %vm913_vm6 = vmor %vm911_vm5, %vm912_vm4 }
 0x177   : > { %v1250_v4 = vsel %vm1103_vm15, 1.0, %v1464_v49  ;;  %v1019_v33 = vsel %vm1018_vm0, %v1407_v9, %v1015_v48  ;;  %1422 = vrcp.f32 %v2250_v53  ;;  %v2261_v5 = vadd.f32 1.0, %v1417_v41 }
 0x178   : > { %1152 = vst.msk [vmem:[%s2165_s4 + $0x48] sm:$0xff] %vm1142_vm8, %v1250_v4  ;;  %v1024_v50 = vsel %vm2215_vm10, %v1023_v12, %v1019_v33  ;;  %v854_v25 = vsel %vm853_vm1, %v1409_v24, %v850_v59  ;;  %v910_v21 = vadd.f32 %v1413_v3, %v909_v30  ;;  %v918_v63 = vor.u32 1.1754944e-38, %v917_v26  ;;  %v740_v24 = vpop.f32.mrf.mxu1 }
 0x179   : > { %vm1106_vm2 = vcmp.gt.f32.partialorder %v1024_v50, %v2158_v8  ;;  %v859_v36 = vsel %vm2225_vm14, %v858_v37, %v854_v25  ;;  %v1421_v18 = vpop.eup %1420  ;;  %v2263_v28 = vadd.f32 1.0, %v1419_v19  ;;  %1424 = vpow2.f32 %v1238_v47 }
 0x17a   : > { %v1253_v15 = vsel %vm1106_vm2, 1.0, %v1464_v49  ;;  %vm1095_vm3 = vcmp.gt.f32.partialorder %v859_v36, %v2158_v8  ;;  %v914_v23 = vsel %vm913_vm6, %v1413_v3, %v910_v21  ;;  %v982_v31 = vmul.f32 %v1421_v18, %v2229_v6 }
 0x17b   : > { %1155 = vst.msk [vmem:[%s2165_s4 + $0x60] sm:$0xff] %vm1142_vm8, %v1253_v15  ;;  %v1242_v0 = vsel %vm1095_vm3, 1.0, %v1464_v49  ;;  %v1227_v55 = vmul.f32 -1.442695, %v728_v7  ;;  %v919_v42 = vsel %vm916_vm7, %v918_v63, %v914_v23  ;;  %v990_v39 = vand.u32 2147483647, %v2229_v6 }
 0x17c   : > { %1144 = vst.msk [vmem:[%s2165_s4 + $0x8] sm:$0xff] %vm1142_vm8, %v1242_v0  ;;  %v992_v44 = vand.u32 2147483648, %v2229_v6  ;;  %1426 = vrcp.f32 %v2261_v5  ;;  %vm1099_vm9 = vcmp.gt.f32.partialorder %v919_v42, %v2158_v8  ;;  %v983_v54 = vsub.f32 1.0, %v982_v31 }
 0x17d   : > { %v764_v29 = vpop.f32.mrf.mxu3  ;;  %vm986_vm10 = vweird.f32 %v2229_v6  ;;  %v1423_v27 = vpop.eup %1422  ;;  %v1246_v9 = vsel %vm1099_vm9, 1.0, %v1464_v49  ;;  %v1035_v34 = vand.u32 2147483647, %v2250_v53  ;;  %v1037_v13 = vand.u32 2147483648, %v2250_v53 }
 0x17e   : > { %1428 = vrcp.f32 %v2263_v28  ;;  %1148 = vst.msk [vmem:[%s2165_s4 + $0x28] sm:$0xff] %vm1142_vm8, %v1246_v9  ;;  %v984_v14 = vmul.f32 %v1421_v18, %v983_v54  ;;  %vm987_vm11 = vweird.f32 %v1421_v18  ;;  %v1027_v40 = vmul.f32 %v1423_v27, %v2250_v53 }
 0x17f   : > { %v1239_v51 = vmul.f32 -1.442695, %v764_v29  ;;  %v1425_v32 = vpop.eup %1424  ;;  %vm2278_vm12 = vcmp.eq.f32.partialorder %v990_v39, 8.507059e+37  ;;  %v993_v35 = vor.u32 1.1754944e-38, %v992_v44  ;;  %vm1031_vm13 = vweird.f32 %v2250_v53  ;;  %v752_v61 = vpop.f32.mrf.mxu2  ;;  %vm988_vm14 = vmor %vm986_vm10, %vm987_vm11 }
 0x180   : > { %1430 = vpow2.f32 %v1227_v55  ;;  %v985_v46 = vadd.f32 %v1421_v18, %v984_v14  ;;  %v1028_v56 = vsub.f32 1.0, %v1027_v40  ;;  %v2283_v58 = vadd.f32 1.0, %v1425_v32 }
 0x181   : > { %v1231_v16 = vmul.f32 -1.442695, %v740_v24  ;;  %vm1032_vm15 = vweird.f32 %v1423_v27  ;;  %vm2287_vm0 = vcmp.eq.f32.partialorder %v1035_v34, 8.507059e+37  ;;  %v1038_v43 = vor.u32 1.1754944e-38, %v1037_v13 }
 0x182   : > { %v1427_v10 = vpop.eup %1426  ;;  %vm866_vm1 = vweird.f32 %v2261_v5  ;;  %v989_v12 = vsel %vm988_vm14, %v1421_v18, %v985_v46  ;;  %v1029_v38 = vmul.f32 %v1423_v27, %v1028_v56  ;;  %1432 = vpow2.f32 %v1239_v51  ;;  %vm1033_vm3 = vmor %vm1031_vm13, %vm1032_vm15 }
 0x183   : > { %v862_v11 = vmul.f32 %v1427_v10, %v2261_v5  ;;  %v994_v3 = vsel %vm2278_vm12, %v993_v35, %v989_v12  ;;  %v870_v1 = vand.u32 2147483647, %v2261_v5  ;;  %1434 = vrcp.f32 %v2283_v58 }
 0x184   : > { %v1429_v52 = vpop.eup %1428  ;;  %v1235_v48 = vmul.f32 -1.442695, %v752_v61  ;;  %vm1104_vm2 = vcmp.gt.f32.partialorder %v994_v3, %v2158_v8  ;;  %v1030_v20 = vadd.f32 %v1423_v27, %v1029_v38  ;;  %vm867_vm4 = vweird.f32 %v1427_v10 }
 0x185   : > { %v863_v6 = vsub.f32 1.0, %v862_v11  ;;  %v922_v17 = vmul.f32 %v1429_v52, %v2263_v28  ;;  %v1251_v37 = vsel %vm1104_vm2, 1.0, %v1464_v49  ;;  %v872_v60 = vand.u32 2147483648, %v2261_v5  ;;  %vm868_vm7 = vmor %vm866_vm1, %vm867_vm4 }
 0x186   : > { %v1431_v59 = vpop.eup %1430  ;;  %v930_v2 = vand.u32 2147483647, %v2263_v28  ;;  %1153 = vst.msk [vmem:[%s2165_s4 + $0x50] sm:$0xff] %vm1142_vm8, %v1251_v37  ;;  %v1034_v4 = vsel %vm1033_vm3, %v1423_v27, %v1030_v20  ;;  %vm927_vm5 = vweird.f32 %v1429_v52  ;;  %v932_v57 = vand.u32 2147483648, %v2263_v28 }
 0x187   : > { %v864_v33 = vmul.f32 %v1427_v10, %v863_v6  ;;  %v923_v22 = vsub.f32 1.0, %v922_v17  ;;  %v2307_v50 = vadd.f32 1.0, %v1431_v59  ;;  %v1039_v25 = vsel %vm2287_vm0, %v1038_v43, %v1034_v4 }
 0x188   : > { %1436 = vpow2.f32 %v1235_v48  ;;  %v1433_v26 = vpop.eup %1432  ;;  %vm1107_vm6 = vcmp.gt.f32.partialorder %v1039_v25, %v2158_v8  ;;  %vm871_vm9 = vcmp.eq.f32.partialorder %v870_v1, 8.507059e+37  ;;  %v873_v19 = vor.u32 1.1754944e-38, %v872_v60 }
 0x189   : > { %v865_v41 = vadd.f32 %v1427_v10, %v864_v33  ;;  %v924_v36 = vmul.f32 %v1429_v52, %v923_v22  ;;  %1438 = vrcp.f32 %v2307_v50  ;;  %v1435_v53 = vpop.eup %1434  ;;  %v1254_v47 = vsel %vm1107_vm6, 1.0, %v1464_v49 }
 0x18a   : > { %vm926_vm10 = vweird.f32 %v2263_v28  ;;  %1156 = vst.msk [vmem:[%s2165_s4 + $0x68] sm:$0xff] %vm1142_vm8, %v1254_v47  ;;  %vm931_vm11 = vcmp.eq.f32.partialorder %v930_v2, 8.507059e+37  ;;  %v1042_v0 = vmul.f32 %v1435_v53, %v2283_v58  ;;  %v933_v21 = vor.u32 1.1754944e-38, %v932_v57 }
 0x18b   : > { %v869_v15 = vsel %vm868_vm7, %v1427_v10, %v865_v41  ;;  %v925_v30 = vadd.f32 %v1429_v52, %v924_v36  ;;  %vm928_vm12 = vmor %vm926_vm10, %vm927_vm5  ;;  %v1050_v18 = vand.u32 2147483647, %v2283_v58  ;;  %v2324_v5 = vadd.f32 1.0, %v1433_v26 }
 0x18c   : > { %v874_v7 = vsel %vm871_vm9, %v873_v19, %v869_v15  ;;  %v1043_v28 = vsub.f32 1.0, %v1042_v0  ;;  %1440 = vpow2.f32 %v1231_v16  ;;  %v1052_v42 = vand.u32 2147483648, %v2283_v58 }
 0x18d   : > { %vm1096_vm13 = vcmp.gt.f32.partialorder %v874_v7, %v2158_v8  ;;  %v929_v63 = vsel %vm928_vm12, %v1429_v52, %v925_v30  ;;  %1442 = vrcp.f32 %v2324_v5  ;;  %vm1047_vm15 = vweird.f32 %v1435_v53 }
 0x18e   : > { %v1437_v23 = vpop.eup %1436  ;;  %v1243_v31 = vsel %vm1096_vm13, 1.0, %v1464_v49  ;;  %v934_v55 = vsel %vm931_vm11, %v933_v21, %v929_v63  ;;  %v1044_v44 = vmul.f32 %v1435_v53, %v1043_v28  ;;  %vm1046_vm0 = vweird.f32 %v2283_v58 }
 0x18f   : > { %v1439_v39 = vpop.eup %1438  ;;  %1145 = vst.msk [vmem:[%s2165_s4 + $0x10] sm:$0xff] %vm1142_vm8, %v1243_v31  ;;  %vm1100_vm14 = vcmp.gt.f32.partialorder %v934_v55, %v2158_v8  ;;  %v2333_v29 = vadd.f32 1.0, %v1437_v23  ;;  %vm1048_vm1 = vmor %vm1046_vm0, %vm1047_vm15  ;;  %v1053_v34 = vor.u32 1.1754944e-38, %v1052_v42  ;;  %vm1051_vm2 = vcmp.eq.f32.partialorder %v1050_v18, 8.507059e+37 }
 0x190   : > { %v1247_v54 = vsel %vm1100_vm14, 1.0, %v1464_v49  ;;  %v877_v27 = vmul.f32 %v1439_v39, %v2307_v50  ;;  %v1045_v9 = vadd.f32 %v1435_v53, %v1044_v44  ;;  %v885_v40 = vand.u32 2147483647, %v2307_v50 }
 0x191   : > { %1149 = vst.msk [vmem:[%s2165_s4 + $0x30] sm:$0xff] %vm1142_vm8, %v1247_v54  ;;  %1444 = vrcp.f32 %v2333_v29  ;;  %v887_v51 = vand.u32 2147483648, %v2307_v50  ;;  %vm882_vm3 = vweird.f32 %v1439_v39  ;;  %vm881_vm5 = vweird.f32 %v2307_v50 }
 0x192   : > { %v878_v13 = vsub.f32 1.0, %v877_v27  ;;  %v1441_v24 = vpop.eup %1440  ;;  %v1049_v14 = vsel %vm1048_vm1, %v1435_v53, %v1045_v9  ;;  %vm883_vm6 = vmor %vm881_vm5, %vm882_vm3  ;;  %vm886_vm7 = vcmp.eq.f32.partialorder %v885_v40, 8.507059e+37  ;;  %v1067_v38 = vand.u32 2147483648, %v2324_v5 }
 0x193   : > { %v1443_v32 = vpop.eup %1442  ;;  %v1054_v45 = vsel %vm1051_vm2, %v1053_v34, %v1049_v14  ;;  %v822_v46 = vadd.f32 1.0, %v1441_v24  ;;  %v888_v10 = vor.u32 1.1754944e-38, %v887_v51  ;;  %v1065_v3 = vand.u32 2147483647, %v2324_v5 }
 0x194   : > { %v879_v35 = vmul.f32 %v1439_v39, %v878_v13  ;;  %vm1108_vm4 = vcmp.gt.f32.partialorder %v1054_v45, %v2158_v8  ;;  %v1057_v56 = vmul.f32 %v1443_v32, %v2324_v5  ;;  %vm1062_vm9 = vweird.f32 %v1443_v32 }
 0x195   : > { %v1255_v58 = vsel %vm1108_vm4, 1.0, %v1464_v49  ;;  %1446 = vrcp.f32 %v822_v46  ;;  %v1007_v20 = vand.u32 2147483648, %v2333_v29  ;;  %vm1061_vm11 = vweird.f32 %v2324_v5 }
 0x196   : > { %v880_v61 = vadd.f32 %v1439_v39, %v879_v35  ;;  %1157 = vst.msk [vmem:[%s2165_s4 + $0x70] sm:$0xff] %vm1142_vm8, %v1255_v58  ;;  %v1058_v62 = vsub.f32 1.0, %v1057_v56  ;;  %v1005_v37 = vand.u32 2147483647, %v2333_v29  ;;  %vm1063_vm13 = vmor %vm1061_vm11, %vm1062_vm9  ;;  %v1068_v60 = vor.u32 1.1754944e-38, %v1067_v38 }
 0x197   : > { %v1445_v16 = vpop.eup %1444  ;;  %vm1066_vm14 = vcmp.eq.f32.partialorder %v1065_v3, 8.507059e+37  ;;  %vm1001_vm15 = vweird.f32 %v2333_v29  ;;  %v1008_v50 = vor.u32 1.1754944e-38, %v1007_v20  ;;  %v947_v41 = vand.u32 2147483648, %v822_v46 }
 0x198   : > { %v884_v43 = vsel %vm883_vm6, %v1439_v39, %v880_v61  ;;  %v997_v12 = vmul.f32 %v1445_v16, %v2333_v29  ;;  %v1059_v52 = vmul.f32 %v1443_v32, %v1058_v62  ;;  %vm1002_vm12 = vweird.f32 %v1445_v16 }
 0x199   : > { %v889_v11 = vsel %vm886_vm7, %v888_v10, %v884_v43  ;;  %vm1003_vm0 = vmor %vm1001_vm15, %vm1002_vm12  ;;  %vm1006_vm2 = vcmp.eq.f32.partialorder %v1005_v37, 8.507059e+37  ;;  %v945_v47 = vand.u32 2147483647, %v822_v46  ;;  %vm941_vm5 = vweird.f32 %v822_v46 }
 0x19a   : > { %vm1097_vm10 = vcmp.gt.f32.partialorder %v889_v11, %v2158_v8  ;;  %v998_v1 = vsub.f32 1.0, %v997_v12  ;;  %v1060_v6 = vadd.f32 %v1443_v32, %v1059_v52  ;;  %v948_v30 = vor.u32 1.1754944e-38, %v947_v41 }
 0x19b   : > { %v1244_v48 = vsel %vm1097_vm10, 1.0, %v1464_v49  ;;  %v1447_v17 = vpop.eup %1446  ;;  %vm946_vm7 = vcmp.eq.f32.partialorder %v945_v47, 8.507059e+37 }
 0x19c   : > { %1146 = vst.msk [vmem:[%s2165_s4 + $0x18] sm:$0xff] %vm1142_vm8, %v1244_v48  ;;  %v999_v59 = vmul.f32 %v1445_v16, %v998_v1  ;;  %v1064_v2 = vsel %vm1063_vm13, %v1443_v32, %v1060_v6  ;;  %v937_v4 = vmul.f32 %v1447_v17, %v822_v46  ;;  %vm942_vm3 = vweird.f32 %v1447_v17 }
 0x19d   : > { %v1069_v22 = vsel %vm1066_vm14, %v1068_v60, %v1064_v2  ;;  %vm943_vm6 = vmor %vm941_vm5, %vm942_vm3 }
 0x19e   : > { %v1000_v33 = vadd.f32 %v1445_v16, %v999_v59  ;;  %vm1109_vm1 = vcmp.gt.f32.partialorder %v1069_v22, %v2158_v8  ;;  %v938_v25 = vsub.f32 1.0, %v937_v4 }
 0x19f   : > { %v1256_v26 = vsel %vm1109_vm1, 1.0, %v1464_v49 }
 0x1a0   : > { %v1004_v57 = vsel %vm1003_vm0, %v1445_v16, %v1000_v33  ;;  %1158 = vst.msk [vmem:[%s2165_s4 + $0x78] sm:$0xff] %vm1142_vm8, %v1256_v26  ;;  %v939_v53 = vmul.f32 %v1447_v17, %v938_v25 }
 0x1a1   : > { %v1009_v36 = vsel %vm1006_vm2, %v1008_v50, %v1004_v57 }
 0x1a2   : > { %vm1105_vm4 = vcmp.gt.f32.partialorder %v1009_v36, %v2158_v8  ;;  %v940_v15 = vadd.f32 %v1447_v17, %v939_v53 }
 0x1a3   : > { %v1252_v19 = vsel %vm1105_vm4, 1.0, %v1464_v49 }
 0x1a4   : > { %1154 = vst.msk [vmem:[%s2165_s4 + $0x58] sm:$0xff] %vm1142_vm8, %v1252_v19  ;;  %v944_v0 = vsel %vm943_vm6, %v1447_v17, %v940_v15 }
 0x1a5   : > { %v949_v7 = vsel %vm946_vm7, %v948_v30, %v944_v0 }
 0x1a6   : > { %vm1101_vm9 = vcmp.gt.f32.partialorder %v949_v7, %v2158_v8 }
 0x1a7   : > { %v1248_v21 = vsel %vm1101_vm9, 1.0, %v1464_v49 }
 0x1a8   : > { %1150 = vst.msk [vmem:[%s2165_s4 + $0x38] sm:$0xff] %vm1142_vm8, %v1248_v21 }
 0x1a9 PF: > { %s13_s12 = sadd.s32 1, %s1462_s12  }
 0x1aa   : > { %p10_p4 = scmp.ge.s32.totalorder %s13_s12, 4  }
 0x1ac   :  { %12 = sbr.rel (!%p10_p4) target bundleno = 1 (0x1), region = 62 }

// kernel: gmoe_forward.3
= control target key start
LH: loop header
LB: loop body
LE: loop exit
PB: predicated region body
PF: predicated region fallthrough
CT: control target
= control target key end

     0   :  { %s2043_s0 = inlined_call_operand.vmem [shape: bf16[256,128], index: 0, kind: input, shape index: {}]   ;;  %s2044_s1 = inlined_call_operand.vmem [shape: f32[256,8], index: 1, kind: input, shape index: {}]   ;;  %s2045_s2 = inlined_call_operand.vmem [shape: bf16[8,128,256], index: 2, kind: input, shape index: {}]   ;;  %s2046_s3 = inlined_call_operand.vmem [shape: f32[8,1,256], index: 3, kind: input, shape index: {}]   ;;  %s2047_s4 = inlined_call_operand.vmem [shape: bf16[8,256,128], index: 4, kind: input, shape index: {}]   ;;  %s2048_s5 = inlined_call_operand.vmem [shape: f32[8,1,128], index: 5, kind: input, shape index: {}]   ;;  %s2049_s6 = inlined_call_operand.hbm [shape: f32[256,128], index: 6, kind: output, shape index: {}]  }
   0x1   :  { %2056 = sst [smem:[#allocation13_spill]] %s2043_s0 }
   0x2   :  { %11 = vsyncpa [#allocation4], 0 }
   0x3   :  { %13 = vsyncpa [#allocation4 + $0x1], 0  ;;  %s1685_s21 = smov 0   ;;  %s1687_s22 = smov 0  }
   0x4   :  { %s1689_s23 = smov 0   ;;  %s1691_s24 = smov 0  }
   0x5   :  { %s1693_s25 = smov 0   ;;  %s1695_s26 = smov 0  }
   0x6   :  { %s1697_s27 = smov 0   ;;  %s1699_s28 = smov 0  }
   0x7 LB: > { %2057 = sst [smem:[#allocation6_spill]] %s1625_s23  ;;  %s1251_s29 = sadd.s32 4294967295, %s1645_s28   ;;  %s1645_s28 = sphi %s1699_s28, %s19_s28   ;;  %s1641_s27 = sphi %s1697_s27, %s2076_s27   ;;  %s1637_s26 = sphi %s1695_s26, %s2079_s26   ;;  %s1633_s25 = sphi %s1693_s25, %s2074_s25   ;;  %s1629_s24 = sphi %s1691_s24, %s2073_s24   ;;  %s1625_s23 = sphi %s1689_s23, %s2072_s23   ;;  %s1621_s22 = sphi %s1687_s22, %s2078_s22   ;;  %s1617_s21 = sphi %s1685_s21, %s2077_s21  }
   0x8   : > { %2058 = sst [smem:[#allocation7_spill]] %s1637_s26  ;;  %s1252_s30 = sadd.s32 4294967294, %s1645_s28  }
   0x9   : > { %2059 = sst [smem:[#allocation8_spill]] %s1641_s27  ;;  %s28_s7 = sadd.s32 1, %s1637_s26 }
   0xa   : > { %p29_p0 = scmp.ge.s32.totalorder %s28_s7, 8  ;;  %s31_s8 = sadd.s32 1, %s1641_s27 }
   0xb   : > { %p204_p1 = scmp.ne.s32.totalorder %s1625_s23, %s1621_s22  ;;  %p205_p2 = scmp.eq.s32.totalorder %s1251_s29, 15 }
   0xc   : > { %s2081_s7 = smov (%p29_p0, %s28_s7), 0  ;;  %s2083_s8 = smov (!%p29_p0, %s31_s8), %s1641_s27 }
   0xd   : > { %2060 = sst [smem:[#allocation9_spill]] %s2081_s7  ;;  %p1734_p3 = por %p205_p2, %p204_p1 }
   0xe   : > { %p210_p4 = scmp.ne.s32.totalorder %s1621_s22, %s1617_s21  ;;  %p33_p5 = scmp.ge.s32.totalorder %s2083_s8, 2 }
   0xf   : > { %p211_p6 = scmp.eq.s32.totalorder %s1252_s30, 15  ;;  %p1255_p7 = scmp.ge.s32.totalorder %s1645_s28, 1 }
  0x10   : > { %p276_p8 = scmp.lt.s32.totalorder %s1645_s28, 17  ;;  %s2085_s8 = smov (%p33_p5, %s2083_s8), 0 }
  0x11   : > { %2062 = sst [smem:[#allocation10_spill]] %s2085_s8  ;;  %p1744_p9 = por %p211_p6, %p210_p4 }
  0x12   : > { %p277_p10 = pnand %p1255_p7, %p276_p8  ;;  %s191_s11 = ssub.s32 %s1641_s27, %s2085_s8 }
  0x13   : > { %s2063_s10 = scalar_select %p1744_p9, 1, 0 }
  0x14   : > { %s194_s12 = sadd.s32 1, %s1625_s23  ;;  %p192_p11 = scmp.eq.s32.totalorder %s191_s11, 0 }
  0x15   : > { %2064 = sst [smem:[#allocation11_spill]] %s2063_s10  ;;  %280 = sbr.rel (%p277_p10) target bundleno = 524 (0x20c), region = 44 }
  0x16   : > { %s1752_s13 = scalar_select %p192_p11, %s1625_s23, %s194_s12  }
  0x17   : > { %s2051_s14 = sand.u32 (!%p277_p10), 1, %s1621_s22   ;;  %s1257_s15 = sshll.u32 (!%p277_p10), %s1633_s25, 4 }
  0x18   : > { %2065 = sst [smem:[#allocation12_spill]] %s1752_s13  ;;  %s1256_s16 = sshll.u32 (!%p277_p10), %s2051_s14, 7 }
  0x19   : > { %p329_p12 = scmp.lt.s32.totalorder (!%p277_p10), %s1257_s15, 31  ;;  %p340_p13 = scmp.lt.s32.totalorder (!%p277_p10), %s1629_s24, 7 }
  0x1a   : > { %s2066_s0 = sld [smem:[#allocation13_spill]]  ;;  %p1266_p0 = scmp.ne.s32.totalorder %s1629_s24, 0 }
  0x1b   : > { %s2087_s15 = smov (!%p329_p12, %s1257_s15), 31 }
  0x1c   : > { %s1760_s17 = scalar_select %p340_p13, %s1629_s24, 7 }
  0x1d   : > { %s1258_s18 = sshll.u32 %s2087_s15, 2  ;;  %s1260_s19 = sshll.u32 %s2087_s15, 3 }
  0x1e   : > { %s1770_s8 = scalar_lea.vmem %s2044_s1, %s1260_s19  ;;  %s1433_s14 = sshll.u32 %s1760_s17, 7 }
  0x1f   : > { %s1263_s7 = sshll.u32 %s1760_s17, 1  ;;  %s1777_s13 = scalar_lea.vmem %s2045_s2, %s1433_s14 }
  0x20   : > { %s1765_s30 = scalar_lea.vmem %s2066_s0, %s1258_s18  ;;  %s1782_s15 = scalar_lea.vmem %s2046_s3, %s1263_s7 }
  0x21   : > { %s1787_s29 = scalar_lea.vmem %s2047_s4, %s1433_s14  ;;  %s356_s12 = scalar_lea.vmem %s2048_s5, %s1760_s17 }
  0x22   : > { %s1793_s0 = scalar_lea.vmem [#allocation3], %s1256_s16  ;;  %361 = sbr.rel (%p1266_p0) target bundleno = 56 (0x38), region = 48 }
  0x27   : > { %v1647_v0 = vmov 0.0  }
  0x28   : > { %362 = vst [vmem:[#allocation2 + $0x30] sm:$0xff] %v1647_v0 }
  0x29   : > { %363 = vst [vmem:[#allocation2] sm:$0xff] %v1647_v0 }
  0x2a   : > { %364 = vst [vmem:[#allocation2 + $0x58] sm:$0xff] %v1647_v0 }
  0x2b   : > { %365 = vst [vmem:[#allocation2 + $0x18] sm:$0xff] %v1647_v0 }
  0x2c   : > { %366 = vst [vmem:[#allocation2 + $0x50] sm:$0xff] %v1647_v0 }
  0x2d   : > { %367 = vst [vmem:[#allocation2 + $0x68] sm:$0xff] %v1647_v0 }
  0x2e   : > { %368 = vst [vmem:[#allocation2 + $0x8] sm:$0xff] %v1647_v0 }
  0x2f   : > { %369 = vst [vmem:[#allocation2 + $0x48] sm:$0xff] %v1647_v0 }
  0x30   : > { %370 = vst [vmem:[#allocation2 + $0x40] sm:$0xff] %v1647_v0 }
  0x31   : > { %371 = vst [vmem:[#allocation2 + $0x20] sm:$0xff] %v1647_v0 }
  0x32   : > { %372 = vst [vmem:[#allocation2 + $0x10] sm:$0xff] %v1647_v0 }
  0x33   : > { %373 = vst [vmem:[#allocation2 + $0x38] sm:$0xff] %v1647_v0 }
  0x34   : > { %374 = vst [vmem:[#allocation2 + $0x60] sm:$0xff] %v1647_v0 }
  0x35   : > { %375 = vst [vmem:[#allocation2 + $0x70] sm:$0xff] %v1647_v0 }
  0x36   : > { %376 = vst [vmem:[#allocation2 + $0x78] sm:$0xff] %v1647_v0 }
  0x37   : > { %377 = vst [vmem:[#allocation2 + $0x28] sm:$0xff] %v1647_v0 }
  0x38 PF: > { %v1357_v1 = vld [vmem:[%s1777_s13 + $0x70] sm:$0xf]  ;;  %v1458_v2 = vld [vmem:[%s1777_s13 + $0x74] sm:$0xf0]  ;;  %v1457_v3 = vld [vmem:[%s1777_s13 + $0x74] sm:$0xf] }
  0x39   : > { %v1358_v4 = vor.u32 %v1458_v2, %v1357_v1  ;;  %v1359_v5 = vld [vmem:[%s1777_s13 + $0x78] sm:$0xf0]  ;;  %v1349_v6 = vld [vmem:[%s1777_s13 + $0x60] sm:$0xf]  ;;  %v1456_v7 = vld [vmem:[%s1777_s13 + $0x64] sm:$0xf0] }
  0x3a   : > { %v1362_v8 = vor.u32 %v1457_v3, %v1359_v5  ;;  %v1455_v9 = vld [vmem:[%s1777_s13 + $0x64] sm:$0xf]  ;;  %v1351_v10 = vld [vmem:[%s1777_s13 + $0x68] sm:$0xf0]  ;;  %v1350_v11 = vor.u32 %v1456_v7, %v1349_v6  ;;  %v1341_v13 = vld [vmem:[%s1777_s13 + $0x50] sm:$0xf] }
  0x3b   : > { %629 = vmatpush.bf16.msra.mxu0 %v1358_v4  ;;  %v1354_v12 = vor.u32 %v1455_v9, %v1351_v10  ;;  %v1454_v14 = vld [vmem:[%s1777_s13 + $0x54] sm:$0xf0]  ;;  %v1453_v15 = vld [vmem:[%s1777_s13 + $0x54] sm:$0xf]  ;;  %v1343_v16 = vld [vmem:[%s1777_s13 + $0x58] sm:$0xf0]  ;;  %v378_v9 = vlaneseq }
  0x3c   : > { %678 = vmatpush.bf16.msra.mxu1 %v1362_v8  ;;  %v1342_v17 = vor.u32 %v1454_v14, %v1341_v13  ;;  %v1346_v18 = vor.u32 %v1453_v15, %v1343_v16  ;;  %v1333_v19 = vld [vmem:[%s1777_s13 + $0x40] sm:$0xf]  ;;  %v1452_v20 = vld [vmem:[%s1777_s13 + $0x44] sm:$0xf0]  ;;  %v1451_v21 = vld [vmem:[%s1777_s13 + $0x44] sm:$0xf]  ;;  %v380_v13 = vstv %s1629_s24 }
  0x3d   : > { %v1335_v22 = vld [vmem:[%s1777_s13 + $0x48] sm:$0xf0]  ;;  %v1334_v23 = vor.u32 %v1452_v20, %v1333_v19  ;;  %v1325_v25 = vld [vmem:[%s1777_s13 + $0x30] sm:$0xf]  ;;  %v1450_v26 = vld [vmem:[%s1777_s13 + $0x34] sm:$0xf0] }
  0x3e   : > { %v1338_v24 = vor.u32 %v1451_v21, %v1335_v22  ;;  %v1449_v27 = vld [vmem:[%s1777_s13 + $0x34] sm:$0xf]  ;;  %v1327_v28 = vld [vmem:[%s1777_s13 + $0x38] sm:$0xf0]  ;;  %v1326_v29 = vor.u32 %v1450_v26, %v1325_v25  ;;  %v1317_v31 = vld [vmem:[%s1777_s13 + $0x20] sm:$0xf] }
  0x3f   : > { %630 = vmatpush.bf16.msra.mxu0 %v1350_v11  ;;  %v1330_v30 = vor.u32 %v1449_v27, %v1327_v28  ;;  %v1448_v32 = vld [vmem:[%s1777_s13 + $0x24] sm:$0xf0]  ;;  %v1447_v33 = vld [vmem:[%s1777_s13 + $0x24] sm:$0xf]  ;;  %v1319_v34 = vld [vmem:[%s1777_s13 + $0x28] sm:$0xf0] }
  0x40   : > { %679 = vmatpush.bf16.msra.mxu1 %v1354_v12  ;;  %v1318_v35 = vor.u32 %v1448_v32, %v1317_v31  ;;  %v1322_v36 = vor.u32 %v1447_v33, %v1319_v34  ;;  %v1309_v37 = vld [vmem:[%s1777_s13 + $0x10] sm:$0xf]  ;;  %v1446_v38 = vld [vmem:[%s1777_s13 + $0x14] sm:$0xf0]  ;;  %v1445_v39 = vld [vmem:[%s1777_s13 + $0x14] sm:$0xf] }
  0x41   : > { %v1311_v40 = vld [vmem:[%s1777_s13 + $0x18] sm:$0xf0]  ;;  %v1310_v41 = vor.u32 %v1446_v38, %v1309_v37  ;;  %v1301_v43 = vld [vmem:[%s1777_s13] sm:$0xf]  ;;  %v1444_v44 = vld [vmem:[%s1777_s13 + $0x4] sm:$0xf0] }
  0x42   : > { %v1314_v42 = vor.u32 %v1445_v39, %v1311_v40  ;;  %v1443_v45 = vld [vmem:[%s1777_s13 + $0x4] sm:$0xf]  ;;  %v1303_v46 = vld [vmem:[%s1777_s13 + $0x8] sm:$0xf0]  ;;  %v1302_v47 = vor.u32 %v1444_v44, %v1301_v43  ;;  %v1437_v51 = vld [vmem:[%s1765_s30 + $0x10] sm:$0xff]  ;;  %v379_v10 = vand.u32 127, %v378_v9 }
  0x43   : > { %631 = vmatpush.bf16.msra.mxu0 %v1342_v17  ;;  %v1306_v48 = vor.u32 %v1443_v45, %v1303_v46  ;;  %v1435_v49 = vld [vmem:[%s1765_s30] sm:$0xff]  ;;  %v1436_v50 = vld [vmem:[%s1765_s30 + $0x8] sm:$0xff]  ;;  %v1438_v52 = vld [vmem:[%s1765_s30 + $0x18] sm:$0xff]  ;;  %vm414_vm1 = vcmask 64512   ;;  %p1427_p1 = scmp.ne.s32.totalorder %s1629_s24, 7 }
  0x44   : > { %680 = vmatpush.bf16.msra.mxu1 %v1346_v18  ;;  %v1439_v53 = vld [vmem:[%s1765_s30 + $0x20] sm:$0xff]  ;;  %v1466_v54 = vld [vmem:[%s1787_s29 + $0x38] sm:$0xff]  ;;  %v1440_v56 = vld [vmem:[%s1765_s30 + $0x28] sm:$0xff]  ;;  %vm1854_vm0 = vcmp.eq.s32.totalorder %v379_v10, %v380_v13 }
  0x45   : > { %v1474_v55 = vld [vmem:[%s1787_s29 + $0x78] sm:$0xff]  ;;  %907 = vmatpush.bf16.msra.mxu2 %v1466_v54  ;;  %v1465_v57 = vld [vmem:[%s1787_s29 + $0x30] sm:$0xff]  ;;  %v1464_v59 = vld [vmem:[%s1787_s29 + $0x28] sm:$0xff] }
  0x46   : > { %956 = vmatpush.bf16.msra.mxu3 %v1474_v55  ;;  %v1473_v58 = vld [vmem:[%s1787_s29 + $0x70] sm:$0xff]  ;;  %v1472_v60 = vld [vmem:[%s1787_s29 + $0x68] sm:$0xff]  ;;  %v1463_v61 = vld [vmem:[%s1787_s29 + $0x20] sm:$0xff] }
  0x47   : > { %632 = vmatpush.bf16.msra.mxu0 %v1334_v23  ;;  %v1471_v62 = vld [vmem:[%s1787_s29 + $0x60] sm:$0xff]  ;;  %v1441_v63 = vld [vmem:[%s1765_s30 + $0x30] sm:$0xff]  ;;  %v1462_v0 = vld [vmem:[%s1787_s29 + $0x18] sm:$0xff] }
  0x48   : > { %681 = vmatpush.bf16.msra.mxu1 %v1338_v24  ;;  %v1470_v1 = vld [vmem:[%s1787_s29 + $0x58] sm:$0xff]  ;;  %v1461_v2 = vld [vmem:[%s1787_s29 + $0x10] sm:$0xff]  ;;  %v1460_v4 = vld [vmem:[%s1787_s29 + $0x8] sm:$0xff] }
  0x49   : > { %908 = vmatpush.bf16.msra.mxu2 %v1465_v57  ;;  %v1469_v3 = vld [vmem:[%s1787_s29 + $0x50] sm:$0xff]  ;;  %v1468_v5 = vld [vmem:[%s1787_s29 + $0x48] sm:$0xff]  ;;  %v1459_v6 = vld [vmem:[%s1787_s29] sm:$0xff] }
  0x4a   : > { %957 = vmatpush.bf16.msra.mxu3 %v1473_v58  ;;  %v1467_v7 = vld [vmem:[%s1787_s29 + $0x40] sm:$0xff]  ;;  %v1442_v8 = vld [vmem:[%s1765_s30 + $0x38] sm:$0xff]  ;;  %v383_v26 = vld [vmem:[%s1770_s8 + $0x8] sm:$0xff] }
  0x4b   : > { %633 = vmatpush.bf16.msra.mxu0 %v1326_v29  ;;  %v495_v11 = vld [vmem:[%s1782_s15] sm:$0x3]  ;;  %v399_v28 = vsel %vm1854_vm0, %v383_v26, 0.0  ;;  %v384_v38 = vld [vmem:[%s1770_s8 + $0x10] sm:$0xff]  ;;  %v385_v46 = vld [vmem:[%s1770_s8 + $0x18] sm:$0xff] }
  0x4c   : > { %682 = vmatpush.bf16.msra.mxu1 %v1330_v30  ;;  %v382_v16 = vld [vmem:[%s1770_s8] sm:$0xff]  ;;  %v1861_v18 = vperm.slane %v495_v11, 0  ;;  %v1864_v20 = vperm.slane %v495_v11, 1  ;;  %v418_v31 = vsel %vm414_vm1, %v399_v28, 0.0  ;;  %v400_v39 = vsel %vm1854_vm0, %v384_v38, 0.0 }
  0x4d   : > { %909 = vmatpush.bf16.msra.mxu2 %v1464_v59  ;;  %v398_v17 = vsel %vm1854_vm0, %v382_v16, 0.0  ;;  %v421_v40 = vsel %vm414_vm1, %v400_v39, 0.0  ;;  %v386_v58 = vld [vmem:[%s1770_s8 + $0x20] sm:$0xff] }
  0x4e   : > { %958 = vmatpush.bf16.msra.mxu3 %v1472_v60  ;;  %v415_v19 = vsel %vm414_vm1, %v398_v17, 0.0  ;;  %422 = vadd.xlane.f32.xlu1 %v421_v40  ;;  %v402_v59 = vsel %vm1854_vm0, %v386_v58, 0.0 }
  0x4f   : > { %634 = vmatpush.bf16.msra.mxu0 %v1318_v35  ;;  %416 = vadd.xlane.f32.xlu0 %v415_v19  ;;  %v427_v60 = vsel %vm414_vm1, %v402_v59, 0.0 }
  0x50   : > { %683 = vmatpush.bf16.msra.mxu1 %v1322_v36  ;;  %428 = vadd.xlane.f32.xlu2 %v427_v60 }
  0x51   : > { %910 = vmatpush.bf16.msra.mxu2 %v1463_v61 }
  0x52   : > { %959 = vmatpush.bf16.msra.mxu3 %v1471_v62 }
  0x53   : > { %635 = vmatpush.bf16.msra.mxu0 %v1310_v41 }
  0x54   : > { %684 = vmatpush.bf16.msra.mxu1 %v1314_v42 }
  0x55   : > { %911 = vmatpush.bf16.msra.mxu2 %v1462_v0 }
  0x56   : > { %960 = vmatpush.bf16.msra.mxu3 %v1470_v1 }
  0x57   : > { %636 = vmatpush.bf16.msra.mxu0 %v1302_v47  ;;  %419 = vadd.xlane.f32.xlu0 %v418_v31 }
  0x58   : > { %685 = vmatpush.bf16.msra.mxu1 %v1306_v48  ;;  %v401_v48 = vsel %vm1854_vm0, %v385_v46, 0.0 }
  0x59   : > { %912 = vmatpush.bf16.msra.mxu2 %v1461_v2  ;;  %v387_v2 = vld [vmem:[%s1770_s8 + $0x28] sm:$0xff] }
  0x5a   : > { %637 = vmatmul.bf16.vlgmr.msra.gmra.mxu0 %v1435_v49  ;;  %961 = vmatpush.bf16.msra.mxu3 %v1469_v3 }
  0x5b   : > { %686 = vmatmul.bf16.vlgmr.msra.gmra.mxu1 %v1435_v49 }
  0x5d   : > { %913 = vmatpush.bf16.msra.mxu2 %v1460_v4  ;;  %v403_v4 = vsel %vm1854_vm0, %v387_v2, 0.0 }
  0x5e   : > { %962 = vmatpush.bf16.msra.mxu3 %v1468_v5 }
  0x61   : > { %914 = vmatpush.bf16.msra.mxu2 %v1459_v6 }
  0x62   : > { %963 = vmatpush.bf16.msra.mxu3 %v1467_v7  ;;  %v430_v7 = vsel %vm414_vm1, %v403_v4, 0.0 }
  0x63   : > { %431 = vadd.xlane.f32.xlu2 %v430_v7 }
  0x6a   : > { %642 = vmatmul.bf16.gmra.mxu0 %v1436_v50 }
  0x6b   : > { %691 = vmatmul.bf16.gmra.mxu1 %v1436_v50 }
  0x7a   : > { %647 = vmatmul.bf16.gmra.mxu0 %v1437_v51 }
  0x7b   : > { %696 = vmatmul.bf16.gmra.mxu1 %v1437_v51  ;;  %v424_v51 = vsel %vm414_vm1, %v401_v48, 0.0 }
  0x7c   : > { %425 = vadd.xlane.f32.xlu1 %v424_v51 }
  0x8a   : > { %652 = vmatmul.bf16.gmra.mxu0 %v1438_v52 }
  0x8b   : > { %701 = vmatmul.bf16.gmra.mxu1 %v1438_v52 }
  0x9a   : > { %657 = vmatmul.bf16.gmra.mxu0 %v1439_v53 }
  0x9b   : > { %706 = vmatmul.bf16.gmra.mxu1 %v1439_v53 }
  0xaa   : > { %662 = vmatmul.bf16.gmra.mxu0 %v1440_v56 }
  0xab   : > { %711 = vmatmul.bf16.gmra.mxu1 %v1440_v56 }
  0xba   : > { %667 = vmatmul.bf16.gmra.mxu0 %v1441_v63 }
  0xbb   : > { %716 = vmatmul.bf16.gmra.mxu1 %v1441_v63 }
  0xc2   : > { %v417_v15 = vpop.xlane.xlu0 %416 }
  0xca   : > { %672 = vmatmul.bf16.gmra.mxu0 %v1442_v8 }
  0xcb   : > { %721 = vmatmul.bf16.gmra.mxu1 %v1442_v8 }
  0xd7   : > { %v638_v12 = vpop.f32.mrf.mxu0 }
  0xd8   : > { %v687_v14 = vpop.f32.mrf.mxu1  ;;  %v639_v21 = vadd.f32 %v638_v12, %v1861_v18 }
  0xd9   : > { %v688_v22 = vadd.f32 %v687_v14, %v1864_v20  ;;  %v388_v14 = vld [vmem:[%s1770_s8 + $0x30] sm:$0xff] }
  0xda   : > { %v727_v29 = vmax.f32 %v639_v21, 0.0  ;;  %v404_v16 = vsel %vm1854_vm0, %v388_v14, 0.0 }
  0xdb   : > { %v728_v32 = vmax.f32 %v688_v22, 0.0  ;;  %v433_v17 = vsel %vm414_vm1, %v404_v16, 0.0 }
  0xdc   : > { %434 = vadd.xlane.f32.xlu0 %v433_v17 }
  0xdf   : > { %v640_v23 = vpop.f32.mrf.mxu0 }
  0xe0   : > { %v641_v24 = vadd.f32 %v640_v23, %v1861_v18  ;;  %v689_v25 = vpop.f32.mrf.mxu1 }
  0xe1   : > { %v690_v27 = vadd.f32 %v689_v25, %v1864_v20  ;;  %v389_v25 = vld [vmem:[%s1770_s8 + $0x38] sm:$0xff] }
  0xe2   : > { %v729_v30 = vmax.f32 %v641_v24, 0.0 }
  0xe3   : > { %v730_v33 = vmax.f32 %v690_v27, 0.0  ;;  %v405_v27 = vsel %vm1854_vm0, %v389_v25, 0.0 }
  0xe4   : > { %v759_v34 = vpack.c.bf16 %v729_v30, %v727_v29  ;;  %v436_v30 = vsel %vm414_vm1, %v405_v27, 0.0 }
  0xe5   : > { %v760_v35 = vpack.c.bf16 %v730_v33, %v728_v32  ;;  %437 = vadd.xlane.f32.xlu1 %v436_v30 }
  0xe6   : > { %915 = vmatmul.bf16.vlgmr.msra.gmra.mxu2 %v759_v34 }
  0xe7   : > { %964 = vmatmul.bf16.vlgmr.msra.gmra.mxu3 %v760_v35  ;;  %v643_v36 = vpop.f32.mrf.mxu0 }
  0xe8   : > { %v692_v37 = vpop.f32.mrf.mxu1  ;;  %v644_v41 = vadd.f32 %v643_v36, %v1861_v18 }
  0xe9   : > { %v693_v42 = vadd.f32 %v692_v37, %v1864_v20  ;;  %v390_v37 = vld [vmem:[%s1770_s8 + $0x40] sm:$0xff] }
  0xea   : > { %v731_v49 = vmax.f32 %v644_v41, 0.0  ;;  %v406_v38 = vsel %vm1854_vm0, %v390_v37, 0.0 }
  0xeb   : > { %v732_v52 = vmax.f32 %v693_v42, 0.0  ;;  %v439_v39 = vsel %vm414_vm1, %v406_v38, 0.0 }
  0xec   : > { %440 = vadd.xlane.f32.xlu2 %v439_v39 }
  0xef   : > { %v645_v43 = vpop.f32.mrf.mxu0 }
  0xf0   : > { %v646_v44 = vadd.f32 %v645_v43, %v1861_v18  ;;  %v694_v45 = vpop.f32.mrf.mxu1 }
  0xf1   : > { %v695_v47 = vadd.f32 %v694_v45, %v1864_v20  ;;  %v391_v45 = vld [vmem:[%s1770_s8 + $0x48] sm:$0xff] }
  0xf2   : > { %v733_v50 = vmax.f32 %v646_v44, 0.0 }
  0xf3   : > { %v734_v53 = vmax.f32 %v695_v47, 0.0  ;;  %v407_v47 = vsel %vm1854_vm0, %v391_v45, 0.0 }
  0xf4   : > { %v761_v54 = vpack.c.bf16 %v733_v50, %v731_v49  ;;  %v442_v50 = vsel %vm414_vm1, %v407_v47, 0.0 }
  0xf5   : > { %v762_v55 = vpack.c.bf16 %v734_v53, %v732_v52  ;;  %443 = vadd.xlane.f32.xlu0 %v442_v50 }
  0xf6   : > { %920 = vmatmul.bf16.gmra.mxu2 %v761_v54 }
  0xf7   : > { %969 = vmatmul.bf16.gmra.mxu3 %v762_v55  ;;  %v648_v56 = vpop.f32.mrf.mxu0 }
  0xf8   : > { %v697_v57 = vpop.f32.mrf.mxu1  ;;  %v649_v61 = vadd.f32 %v648_v56, %v1861_v18 }
  0xf9   : > { %v698_v62 = vadd.f32 %v697_v57, %v1864_v20  ;;  %v392_v57 = vld [vmem:[%s1770_s8 + $0x50] sm:$0xff] }
  0xfa   : > { %v735_v5 = vmax.f32 %v649_v61, 0.0  ;;  %v408_v58 = vsel %vm1854_vm0, %v392_v57, 0.0  ;;  %v1005_v57 = vld [vmem:[#allocation2 + $0x30] sm:$0xff] }
  0xfb   : > { %v736_v8 = vmax.f32 %v698_v62, 0.0  ;;  %v445_v59 = vsel %vm414_vm1, %v408_v58, 0.0 }
  0xfc   : > { %446 = vadd.xlane.f32.xlu1 %v445_v59 }
  0xff   : > { %v650_v63 = vpop.f32.mrf.mxu0 }
 0x100   : > { %v651_v0 = vadd.f32 %v650_v63, %v1861_v18  ;;  %v699_v1 = vpop.f32.mrf.mxu1 }
 0x101   : > { %v700_v3 = vadd.f32 %v699_v1, %v1864_v20  ;;  %v393_v1 = vld [vmem:[%s1770_s8 + $0x58] sm:$0xff] }
 0x102   : > { %v737_v6 = vmax.f32 %v651_v0, 0.0 }
 0x103   : > { %v738_v9 = vmax.f32 %v700_v3, 0.0  ;;  %v409_v3 = vsel %vm1854_vm0, %v393_v1, 0.0  ;;  %v1006_v1 = vld [vmem:[#allocation2] sm:$0xff] }
 0x104   : > { %v763_v10 = vpack.c.bf16 %v737_v6, %v735_v5  ;;  %v448_v6 = vsel %vm414_vm1, %v409_v3, 0.0 }
 0x105   : > { %v764_v11 = vpack.c.bf16 %v738_v9, %v736_v8  ;;  %449 = vadd.xlane.f32.xlu2 %v448_v6 }
 0x106   : > { %925 = vmatmul.bf16.gmra.mxu2 %v763_v10 }
 0x107   : > { %974 = vmatmul.bf16.gmra.mxu3 %v764_v11  ;;  %v653_v12 = vpop.f32.mrf.mxu0 }
 0x108   : > { %v702_v13 = vpop.f32.mrf.mxu1  ;;  %v654_v19 = vadd.f32 %v653_v12, %v1861_v18  ;;  %v394_v12 = vld [vmem:[%s1770_s8 + $0x60] sm:$0xff] }
 0x109   : > { %v703_v21 = vadd.f32 %v702_v13, %v1864_v20  ;;  %v395_v13 = vld [vmem:[%s1770_s8 + $0x68] sm:$0xff]  ;;  %v410_v16 = vsel %vm1854_vm0, %v394_v12, 0.0 }
 0x10a   : > { %v739_v28 = vmax.f32 %v654_v19, 0.0  ;;  %v411_v17 = vsel %vm1854_vm0, %v395_v13, 0.0  ;;  %v451_v19 = vsel %vm414_vm1, %v410_v16, 0.0 }
 0x10b   : > { %v740_v31 = vmax.f32 %v703_v21, 0.0  ;;  %v454_v21 = vsel %vm414_vm1, %v411_v17, 0.0  ;;  %452 = vadd.xlane.f32.xlu0 %v451_v19  ;;  %v1008_v19 = vld [vmem:[#allocation2 + $0x18] sm:$0xff] }
 0x10c   : > { %455 = vadd.xlane.f32.xlu1 %v454_v21 }
 0x10f   : > { %v655_v22 = vpop.f32.mrf.mxu0 }
 0x110   : > { %v656_v23 = vadd.f32 %v655_v22, %v1861_v18  ;;  %v704_v24 = vpop.f32.mrf.mxu1 }
 0x111   : > { %v705_v26 = vadd.f32 %v704_v24, %v1864_v20 }
 0x112   : > { %v741_v29 = vmax.f32 %v656_v23, 0.0 }
 0x113   : > { %v742_v32 = vmax.f32 %v705_v26, 0.0 }
 0x114   : > { %v765_v33 = vpack.c.bf16 %v741_v29, %v739_v28 }
 0x115   : > { %v766_v34 = vpack.c.bf16 %v742_v32, %v740_v31 }
 0x116   : > { %930 = vmatmul.bf16.gmra.mxu2 %v765_v33 }
 0x117   : > { %979 = vmatmul.bf16.gmra.mxu3 %v766_v34  ;;  %v658_v35 = vpop.f32.mrf.mxu0 }
 0x118   : > { %v707_v36 = vpop.f32.mrf.mxu1  ;;  %v659_v40 = vadd.f32 %v658_v35, %v1861_v18 }
 0x119   : > { %v708_v41 = vadd.f32 %v707_v36, %v1864_v20  ;;  %v396_v36 = vld [vmem:[%s1770_s8 + $0x70] sm:$0xff] }
 0x11a   : > { %v743_v48 = vmax.f32 %v659_v40, 0.0  ;;  %v412_v37 = vsel %vm1854_vm0, %v396_v36, 0.0  ;;  %v1010_v36 = vld [vmem:[#allocation2 + $0x68] sm:$0xff] }
 0x11b   : > { %v744_v51 = vmax.f32 %v708_v41, 0.0  ;;  %v457_v38 = vsel %vm414_vm1, %v412_v37, 0.0 }
 0x11c   : > { %458 = vadd.xlane.f32.xlu2 %v457_v38 }
 0x11f   : > { %v660_v42 = vpop.f32.mrf.mxu0 }
 0x120   : > { %v661_v43 = vadd.f32 %v660_v42, %v1861_v18  ;;  %v709_v44 = vpop.f32.mrf.mxu1 }
 0x121   : > { %v710_v46 = vadd.f32 %v709_v44, %v1864_v20  ;;  %v397_v44 = vld [vmem:[%s1770_s8 + $0x78] sm:$0xff] }
 0x122   : > { %v745_v49 = vmax.f32 %v661_v43, 0.0 }
 0x123   : > { %v746_v52 = vmax.f32 %v710_v46, 0.0  ;;  %v413_v46 = vsel %vm1854_vm0, %v397_v44, 0.0  ;;  %v1011_v44 = vld [vmem:[#allocation2 + $0x8] sm:$0xff] }
 0x124   : > { %v767_v53 = vpack.c.bf16 %v745_v49, %v743_v48  ;;  %v460_v49 = vsel %vm414_vm1, %v413_v46, 0.0 }
 0x125   : > { %v768_v54 = vpack.c.bf16 %v746_v52, %v744_v51  ;;  %461 = vadd.xlane.f32.xlu0 %v460_v49 }
 0x126   : > { %935 = vmatmul.bf16.gmra.mxu2 %v767_v53 }
 0x127   : > { %984 = vmatmul.bf16.gmra.mxu3 %v768_v54  ;;  %v663_v55 = vpop.f32.mrf.mxu0 }
 0x128   : > { %v712_v56 = vpop.f32.mrf.mxu1  ;;  %v664_v60 = vadd.f32 %v663_v55, %v1861_v18 }
 0x129   : > { %v713_v61 = vadd.f32 %v712_v56, %v1864_v20 }
 0x12a   : > { %v747_v4 = vmax.f32 %v664_v60, 0.0 }
 0x12b   : > { %v748_v7 = vmax.f32 %v713_v61, 0.0 }
 0x12f   : > { %v665_v62 = vpop.f32.mrf.mxu0 }
 0x130   : > { %v666_v63 = vadd.f32 %v665_v62, %v1861_v18  ;;  %v714_v0 = vpop.f32.mrf.mxu1 }
 0x131   : > { %v715_v2 = vadd.f32 %v714_v0, %v1864_v20 }
 0x132   : > { %v749_v5 = vmax.f32 %v666_v63, 0.0  ;;  %v420_v63 = vpop.xlane.xlu0 %419 }
 0x133   : > { %v750_v8 = vmax.f32 %v715_v2, 0.0 }
 0x134   : > { %v769_v9 = vpack.c.bf16 %v749_v5, %v747_v4  ;;  %v423_v5 = vpop.xlane.xlu1 %422 }
 0x135   : > { %v770_v10 = vpack.c.bf16 %v750_v8, %v748_v7 }
 0x136   : > { %940 = vmatmul.bf16.gmra.mxu2 %v769_v9  ;;  %v1007_v9 = vld [vmem:[#allocation2 + $0x58] sm:$0xff] }
 0x137   : > { %989 = vmatmul.bf16.gmra.mxu3 %v770_v10  ;;  %v668_v11 = vpop.f32.mrf.mxu0 }
 0x138   : > { %v717_v14 = vpop.f32.mrf.mxu1  ;;  %v669_v22 = vadd.f32 %v668_v11, %v1861_v18 }
 0x139   : > { %v718_v23 = vadd.f32 %v717_v14, %v1864_v20 }
 0x13a   : > { %v751_v28 = vmax.f32 %v669_v22, 0.0 }
 0x13b   : > { %v752_v30 = vmax.f32 %v718_v23, 0.0 }
 0x13c   : > { %v426_v16 = vpop.xlane.xlu1 %425 }
 0x13f   : > { %v670_v24 = vpop.f32.mrf.mxu0 }
 0x140   : > { %v671_v25 = vadd.f32 %v670_v24, %v1861_v18  ;;  %v719_v26 = vpop.f32.mrf.mxu1  ;;  %v429_v24 = vpop.xlane.xlu2 %428 }
 0x141   : > { %v720_v27 = vadd.f32 %v719_v26, %v1864_v20 }
 0x142   : > { %v753_v29 = vmax.f32 %v671_v25, 0.0 }
 0x143   : > { %v754_v31 = vmax.f32 %v720_v27, 0.0 }
 0x144   : > { %v771_v32 = vpack.c.bf16 %v753_v29, %v751_v28  ;;  %v1009_v28 = vld [vmem:[#allocation2 + $0x50] sm:$0xff] }
 0x145   : > { %v772_v33 = vpack.c.bf16 %v754_v31, %v752_v30 }
 0x146   : > { %945 = vmatmul.bf16.gmra.mxu2 %v771_v32 }
 0x147   : > { %994 = vmatmul.bf16.gmra.mxu3 %v772_v33  ;;  %v673_v34 = vpop.f32.mrf.mxu0 }
 0x148   : > { %v722_v35 = vpop.f32.mrf.mxu1  ;;  %v674_v39 = vadd.f32 %v673_v34, %v1861_v18  ;;  %v432_v34 = vpop.xlane.xlu2 %431 }
 0x149   : > { %v723_v40 = vadd.f32 %v722_v35, %v1864_v20 }
 0x14a   : > { %v755_v47 = vmax.f32 %v674_v39, 0.0 }
 0x14b   : > { %v756_v50 = vmax.f32 %v723_v40, 0.0 }
 0x14f   : > { %v675_v41 = vpop.f32.mrf.mxu0 }
 0x150   : > { %v676_v42 = vadd.f32 %v675_v41, %v1861_v18  ;;  %v724_v43 = vpop.f32.mrf.mxu1  ;;  %v1963_v18 = vld [vmem:[%s356_s12] ss:$0 sm:$0xff] }
 0x151   : > { %v725_v45 = vadd.f32 %v724_v43, %v1864_v20 }
 0x152   : > { %v757_v48 = vmax.f32 %v676_v42, 0.0  ;;  %v435_v42 = vpop.xlane.xlu0 %434 }
 0x153   : > { %v758_v51 = vmax.f32 %v725_v45, 0.0 }
 0x154   : > { %v773_v52 = vpack.c.bf16 %v757_v48, %v755_v47 }
 0x155   : > { %v774_v53 = vpack.c.bf16 %v758_v51, %v756_v50 }
 0x156   : > { %950 = vmatmul.bf16.gmra.mxu2 %v773_v52  ;;  %v1012_v52 = vld [vmem:[#allocation2 + $0x48] sm:$0xff] }
 0x157   : > { %999 = vmatmul.bf16.gmra.mxu3 %v774_v53 }
 0x158   : > { %v438_v50 = vpop.xlane.xlu1 %437 }
 0x169   : > { %v916_v20 = vpop.f32.mrf.mxu2 }
 0x16a   : > { %v917_v54 = vadd.f32 %v1963_v18, %v916_v20  ;;  %v965_v55 = vpop.f32.mrf.mxu3 }
 0x16c   : > { %v966_v56 = vadd.f32 %v965_v55, %v917_v54 }
 0x16e   : > { %v1021_v58 = vmul.f32 %v966_v56, %v417_v15  ;;  %v441_v56 = vpop.xlane.xlu2 %440 }
 0x170   : > { %v1037_v59 = vadd.f32 %v1021_v58, %v1005_v57  ;;  %v1013_v58 = vld [vmem:[#allocation2 + $0x40] sm:$0xff] }
 0x171   : > { %v918_v60 = vpop.f32.mrf.mxu2 }
 0x172   : > { %1053 = vst [vmem:[#allocation2 + $0x30] sm:$0xff] %v1037_v59  ;;  %v919_v61 = vadd.f32 %v1963_v18, %v918_v60  ;;  %v967_v62 = vpop.f32.mrf.mxu3 }
 0x174   : > { %v968_v0 = vadd.f32 %v967_v62, %v919_v61 }
 0x176   : > { %v1022_v2 = vmul.f32 %v968_v0, %v420_v63  ;;  %v444_v0 = vpop.xlane.xlu0 %443 }
 0x178   : > { %v1038_v3 = vadd.f32 %v1022_v2, %v1006_v1  ;;  %v1014_v2 = vld [vmem:[#allocation2 + $0x20] sm:$0xff] }
 0x179   : > { %v921_v4 = vpop.f32.mrf.mxu2 }
 0x17a   : > { %1054 = vst [vmem:[#allocation2] sm:$0xff] %v1038_v3  ;;  %v922_v6 = vadd.f32 %v1963_v18, %v921_v4  ;;  %v970_v7 = vpop.f32.mrf.mxu3 }
 0x17c   : > { %v971_v8 = vadd.f32 %v970_v7, %v922_v6 }
 0x17e   : > { %v1023_v10 = vmul.f32 %v971_v8, %v423_v5  ;;  %v447_v8 = vpop.xlane.xlu1 %446 }
 0x180   : > { %v1039_v11 = vadd.f32 %v1023_v10, %v1007_v9  ;;  %v1015_v10 = vld [vmem:[#allocation2 + $0x10] sm:$0xff] }
 0x181   : > { %v923_v12 = vpop.f32.mrf.mxu2 }
 0x182   : > { %1055 = vst [vmem:[#allocation2 + $0x58] sm:$0xff] %v1039_v11  ;;  %v924_v13 = vadd.f32 %v1963_v18, %v923_v12  ;;  %v972_v14 = vpop.f32.mrf.mxu3 }
 0x184   : > { %v973_v17 = vadd.f32 %v972_v14, %v924_v13 }
 0x186   : > { %v1024_v21 = vmul.f32 %v973_v17, %v426_v16  ;;  %v450_v17 = vpop.xlane.xlu2 %449 }
 0x188   : > { %v1040_v22 = vadd.f32 %v1024_v21, %v1008_v19  ;;  %v1016_v21 = vld [vmem:[#allocation2 + $0x38] sm:$0xff] }
 0x189   : > { %v926_v23 = vpop.f32.mrf.mxu2 }
 0x18a   : > { %1056 = vst [vmem:[#allocation2 + $0x18] sm:$0xff] %v1040_v22  ;;  %v927_v25 = vadd.f32 %v1963_v18, %v926_v23  ;;  %v975_v26 = vpop.f32.mrf.mxu3 }
 0x18c   : > { %v976_v27 = vadd.f32 %v975_v26, %v927_v25 }
 0x18e   : > { %v1025_v29 = vmul.f32 %v976_v27, %v429_v24  ;;  %v453_v27 = vpop.xlane.xlu0 %452 }
 0x190   : > { %v1041_v30 = vadd.f32 %v1025_v29, %v1009_v28  ;;  %v1017_v29 = vld [vmem:[#allocation2 + $0x60] sm:$0xff] }
 0x191   : > { %v928_v31 = vpop.f32.mrf.mxu2 }
 0x192   : > { %1057 = vst [vmem:[#allocation2 + $0x50] sm:$0xff] %v1041_v30  ;;  %v929_v32 = vadd.f32 %v1963_v18, %v928_v31  ;;  %v977_v33 = vpop.f32.mrf.mxu3 }
 0x194   : > { %v978_v35 = vadd.f32 %v977_v33, %v929_v32 }
 0x196   : > { %v1026_v37 = vmul.f32 %v978_v35, %v432_v34  ;;  %v456_v35 = vpop.xlane.xlu1 %455 }
 0x198   : > { %v1042_v38 = vadd.f32 %v1026_v37, %v1010_v36  ;;  %v1018_v37 = vld [vmem:[#allocation2 + $0x70] sm:$0xff] }
 0x199   : > { %v931_v39 = vpop.f32.mrf.mxu2 }
 0x19a   : > { %1058 = vst [vmem:[#allocation2 + $0x68] sm:$0xff] %v1042_v38  ;;  %v932_v40 = vadd.f32 %v1963_v18, %v931_v39  ;;  %v980_v41 = vpop.f32.mrf.mxu3 }
 0x19c   : > { %v981_v43 = vadd.f32 %v980_v41, %v932_v40 }
 0x19e   : > { %v1027_v45 = vmul.f32 %v981_v43, %v435_v42  ;;  %v459_v43 = vpop.xlane.xlu2 %458 }
 0x1a0   : > { %v1043_v46 = vadd.f32 %v1027_v45, %v1011_v44  ;;  %v1019_v45 = vld [vmem:[#allocation2 + $0x78] sm:$0xff] }
 0x1a1   : > { %v933_v47 = vpop.f32.mrf.mxu2 }
 0x1a2   : > { %1059 = vst [vmem:[#allocation2 + $0x8] sm:$0xff] %v1043_v46  ;;  %v934_v48 = vadd.f32 %v1963_v18, %v933_v47  ;;  %v982_v49 = vpop.f32.mrf.mxu3 }
 0x1a4   : > { %v983_v51 = vadd.f32 %v982_v49, %v934_v48 }
 0x1a6   : > { %v1028_v53 = vmul.f32 %v983_v51, %v438_v50  ;;  %v462_v51 = vpop.xlane.xlu0 %461 }
 0x1a8   : > { %v1044_v20 = vadd.f32 %v1028_v53, %v1012_v52  ;;  %v1020_v53 = vld [vmem:[#allocation2 + $0x28] sm:$0xff] }
 0x1a9   : > { %v936_v15 = vpop.f32.mrf.mxu2 }
 0x1aa   : > { %1060 = vst [vmem:[#allocation2 + $0x48] sm:$0xff] %v1044_v20  ;;  %v937_v54 = vadd.f32 %v1963_v18, %v936_v15  ;;  %v985_v55 = vpop.f32.mrf.mxu3 }
 0x1ac   : > { %v986_v57 = vadd.f32 %v985_v55, %v937_v54 }
 0x1ae   : > { %v1029_v59 = vmul.f32 %v986_v57, %v441_v56 }
 0x1b0   : > { %v1045_v60 = vadd.f32 %v1029_v59, %v1013_v58 }
 0x1b1   : > { %v938_v61 = vpop.f32.mrf.mxu2 }
 0x1b2   : > { %1061 = vst [vmem:[#allocation2 + $0x40] sm:$0xff] %v1045_v60  ;;  %v939_v62 = vadd.f32 %v1963_v18, %v938_v61  ;;  %v987_v63 = vpop.f32.mrf.mxu3 }
 0x1b4   : > { %v988_v1 = vadd.f32 %v987_v63, %v939_v62 }
 0x1b6   : > { %v1030_v3 = vmul.f32 %v988_v1, %v444_v0 }
 0x1b8   : > { %v1046_v4 = vadd.f32 %v1030_v3, %v1014_v2 }
 0x1b9   : > { %v941_v5 = vpop.f32.mrf.mxu2 }
 0x1ba   : > { %1062 = vst [vmem:[#allocation2 + $0x20] sm:$0xff] %v1046_v4  ;;  %v942_v6 = vadd.f32 %v1963_v18, %v941_v5  ;;  %v990_v7 = vpop.f32.mrf.mxu3 }
 0x1bc   : > { %v991_v9 = vadd.f32 %v990_v7, %v942_v6 }
 0x1be   : > { %v1031_v11 = vmul.f32 %v991_v9, %v447_v8 }
 0x1c0   : > { %v1047_v12 = vadd.f32 %v1031_v11, %v1015_v10 }
 0x1c1   : > { %v943_v13 = vpop.f32.mrf.mxu2 }
 0x1c2   : > { %1063 = vst [vmem:[#allocation2 + $0x10] sm:$0xff] %v1047_v12  ;;  %v944_v14 = vadd.f32 %v1963_v18, %v943_v13  ;;  %v992_v16 = vpop.f32.mrf.mxu3 }
 0x1c4   : > { %v993_v19 = vadd.f32 %v992_v16, %v944_v14 }
 0x1c6   : > { %v1032_v22 = vmul.f32 %v993_v19, %v450_v17 }
 0x1c8   : > { %v1048_v23 = vadd.f32 %v1032_v22, %v1016_v21 }
 0x1c9   : > { %v946_v24 = vpop.f32.mrf.mxu2 }
 0x1ca   : > { %1064 = vst [vmem:[#allocation2 + $0x38] sm:$0xff] %v1048_v23  ;;  %v947_v25 = vadd.f32 %v1963_v18, %v946_v24  ;;  %v995_v26 = vpop.f32.mrf.mxu3 }
 0x1cc   : > { %v996_v28 = vadd.f32 %v995_v26, %v947_v25 }
 0x1ce   : > { %v1033_v30 = vmul.f32 %v996_v28, %v453_v27 }
 0x1d0   : > { %v1049_v31 = vadd.f32 %v1033_v30, %v1017_v29 }
 0x1d1   : > { %v948_v32 = vpop.f32.mrf.mxu2 }
 0x1d2   : > { %1065 = vst [vmem:[#allocation2 + $0x60] sm:$0xff] %v1049_v31  ;;  %v949_v33 = vadd.f32 %v1963_v18, %v948_v32  ;;  %v997_v34 = vpop.f32.mrf.mxu3 }
 0x1d4   : > { %v998_v36 = vadd.f32 %v997_v34, %v949_v33 }
 0x1d6   : > { %v1034_v38 = vmul.f32 %v998_v36, %v456_v35 }
 0x1d8   : > { %v1050_v39 = vadd.f32 %v1034_v38, %v1018_v37 }
 0x1d9   : > { %v951_v40 = vpop.f32.mrf.mxu2 }
 0x1da   : > { %1066 = vst [vmem:[#allocation2 + $0x70] sm:$0xff] %v1050_v39  ;;  %v952_v41 = vadd.f32 %v1963_v18, %v951_v40  ;;  %v1000_v42 = vpop.f32.mrf.mxu3 }
 0x1dc   : > { %v1001_v44 = vadd.f32 %v1000_v42, %v952_v41 }
 0x1de   : > { %v1035_v46 = vmul.f32 %v1001_v44, %v459_v43 }
 0x1e0   : > { %v1051_v47 = vadd.f32 %v1035_v46, %v1019_v45 }
 0x1e1   : > { %v953_v48 = vpop.f32.mrf.mxu2 }
 0x1e2   : > { %1067 = vst [vmem:[#allocation2 + $0x78] sm:$0xff] %v1051_v47  ;;  %v954_v49 = vadd.f32 %v1963_v18, %v953_v48  ;;  %v1002_v50 = vpop.f32.mrf.mxu3 }
 0x1e4   : > { %v1003_v52 = vadd.f32 %v1002_v50, %v954_v49 }
 0x1e6   : > { %v1036_v20 = vmul.f32 %v1003_v52, %v462_v51  ;;  %1072 = sbr.rel (%p1427_p1) target bundleno = 508 (0x1fc), region = 52 }
 0x1e8   : > { %v1052_v15 = vadd.f32 %v1036_v20, %v1020_v53 }
 0x1ea   : > { %1068 = vst [vmem:[#allocation2 + $0x28] sm:$0xff] %v1052_v15 }
 0x1eb   : > { %v1073_v54 = vld [vmem:[#allocation2 + $0x30] sm:$0xff]  ;;  %v1074_v55 = vld [vmem:[#allocation2] sm:$0xff]  ;;  %v1075_v18 = vld [vmem:[#allocation2 + $0x58] sm:$0xff] }
 0x1ec   : > { %1089 = vst [vmem:[%s1793_s0] sm:$0xff] %v1073_v54  ;;  %v1076_v56 = vld [vmem:[#allocation2 + $0x18] sm:$0xff]  ;;  %v1077_v57 = vld [vmem:[#allocation2 + $0x50] sm:$0xff]  ;;  %v1078_v58 = vld [vmem:[#allocation2 + $0x68] sm:$0xff] }
 0x1ed   : > { %1090 = vst [vmem:[%s1793_s0 + $0x8] sm:$0xff] %v1074_v55  ;;  %v1079_v59 = vld [vmem:[#allocation2 + $0x8] sm:$0xff]  ;;  %v1081_v61 = vld [vmem:[#allocation2 + $0x40] sm:$0xff]  ;;  %v1083_v63 = vld [vmem:[#allocation2 + $0x10] sm:$0xff] }
 0x1ee   : > { %1091 = vst [vmem:[%s1793_s0 + $0x10] sm:$0xff] %v1075_v18  ;;  %v1080_v60 = vld [vmem:[#allocation2 + $0x48] sm:$0xff]  ;;  %v1082_v62 = vld [vmem:[#allocation2 + $0x20] sm:$0xff]  ;;  %v1084_v0 = vld [vmem:[#allocation2 + $0x38] sm:$0xff] }
 0x1ef   : > { %1092 = vst [vmem:[%s1793_s0 + $0x18] sm:$0xff] %v1076_v56  ;;  %v1085_v1 = vld [vmem:[#allocation2 + $0x60] sm:$0xff]  ;;  %v1086_v2 = vld [vmem:[#allocation2 + $0x70] sm:$0xff]  ;;  %v1087_v3 = vld [vmem:[#allocation2 + $0x78] sm:$0xff] }
 0x1f0   : > { %1093 = vst [vmem:[%s1793_s0 + $0x20] sm:$0xff] %v1077_v57 }
 0x1f1   : > { %1094 = vst [vmem:[%s1793_s0 + $0x28] sm:$0xff] %v1078_v58  ;;  %v1088_v4 = vld [vmem:[#allocation2 + $0x28] sm:$0xff] }
 0x1f2   : > { %1095 = vst [vmem:[%s1793_s0 + $0x30] sm:$0xff] %v1079_v59 }
 0x1f3   : > { %1096 = vst [vmem:[%s1793_s0 + $0x38] sm:$0xff] %v1080_v60 }
 0x1f4   : > { %1097 = vst [vmem:[%s1793_s0 + $0x40] sm:$0xff] %v1081_v61 }
 0x1f5   : > { %1098 = vst [vmem:[%s1793_s0 + $0x48] sm:$0xff] %v1082_v62 }
 0x1f6   : > { %1099 = vst [vmem:[%s1793_s0 + $0x50] sm:$0xff] %v1083_v63 }
 0x1f7   : > { %1100 = vst [vmem:[%s1793_s0 + $0x58] sm:$0xff] %v1084_v0 }
 0x1f8   : > { %1101 = vst [vmem:[%s1793_s0 + $0x60] sm:$0xff] %v1085_v1 }
 0x1f9   : > { %1102 = vst [vmem:[%s1793_s0 + $0x68] sm:$0xff] %v1086_v2 }
 0x1fa   : > { %1103 = vst [vmem:[%s1793_s0 + $0x70] sm:$0xff] %v1087_v3 }
 0x1fb   : > { %1104 = vst [vmem:[%s1793_s0 + $0x78] sm:$0xff] %v1088_v4 }
 0x1fc PF: > { %s1475_s24 = sshll.u32 %s1633_s25, 7  ;;  %s1118_s10 = sshll.u32 %s1793_s0, 4  ;;  %s1119_s10 = int_to_ptr.vmem [resolvable:$true] %s1118_s10 }
 0x1fd   : > { %s1117_s8 = scalar_lea.hbm %s2049_s6, %s1475_s24  ;;  %s2069_s14 = sand.u32 1, %s1621_s22  }
 0x1fe   : > { %s1120_s13 = sshll.u32 %s1117_s8, 4  ;;  %s1106_s16 = scalar_lea.sflag [#allocation4], %s2069_s14  ;;  %s1121_s13 = int_to_ptr.hbm [resolvable:$true] %s1120_s13 }
 0x1ff   : > { %s1565_s17 = sshra.s32 %s1121_s13, 4  ;;  %s1571_s25 = scalar_lea.hbm %s2049_s6, 256  ;;  %s1566_s17 = int_to_ptr.hbm [resolvable:$true] %s1565_s17 }
 0x200   : > { %s1567_s30 = scalar_lea.hbm %s1566_s17, 128  ;;  %p1572_p6 = scmp.lt.s32.totalorder %s1566_s17, %s2049_s6 }
 0x201   : > { %p1568_p2 = scmp.ne.s32.totalorder %s1566_s17, %s1567_s30  ;;  %p1573_p7 = scmp.lt.s32.totalorder %s1571_s25, %s1567_s30 }
 0x203   : > { %p1569_p4 = pnand %p1568_p2, %p1734_p3  ;;  %p1574_p8 = por %p1573_p7, %p1572_p6 }
 0x205   : > { %p1570_p5 = pneg %p1569_p4 }
 0x207   : > { %p1575_p10 = pnand %p1574_p8, %p1570_p5 }
 0x209   : > { %1578 = shalt.err (!%p1575_p10)
}
 0x20a   : > { %s1648_s0 = smov 128   ;;  %s1649_s11 = smov 8  }
 0x20b   : > { %1476 = dma.vmem_to_hbm [thread:$0]  (%p1734_p3), %s1119_s10, 2048, %s1121_s13, %s1106_s16, %s1648_s0, %s1648_s0, %s1649_s11  }
 0x20c PF: > { %p1482_p11 = scmp.ge.s32.totalorder %s1645_s28, 2  ;;  %s1135_s12 = sand.u32 1, %s1617_s21  }
 0x20d   : > { %s1136_s23 = scalar_lea.sflag [#allocation4], %s1135_s12 }
 0x20e   : > { %p1479_p12 = pnand %p1482_p11, %p1744_p9 }
 0x210   : > { %p1480_p13 = pneg %p1479_p12 }
 0x212   : > { %1612 = dma.done.wait (%p1480_p13), %s1136_s23, 2048  }
 0x213   : > { %1614 = vsyncadd (%p1480_p13), %s1136_s23, 4294965248  ;;  %s19_s28 = sadd.s32 1, %s1645_s28   ;;  %s2071_s26 = sld [smem:[#allocation6_spill]] }
 0x214   : > { %p16_p0 = scmp.ge.s32.totalorder %s19_s28, 18   ;;  %s2072_s23 = sld [smem:[#allocation12_spill]] }
 0x215   : > { %s2073_s24 = sld [smem:[#allocation7_spill]]  ;;  %s2077_s21 = smov %s1621_s22 }
 0x216   : > { %s2074_s25 = sld [smem:[#allocation8_spill]] }
 0x217   : > { %s2075_s9 = sld [smem:[#allocation9_spill]] }
 0x218   : > { %s2076_s27 = sld [smem:[#allocation10_spill]] }
 0x219   : > { %s2078_s22 = smov %s2071_s26  ;;  %18 = sbr.rel (!%p16_p0) target bundleno = 7 (0x7), region = 102 }
 0x21d   : > { %s2079_s26 = smov %s2075_s9 }
 0x21e   :  { %1142 = vsyncpa [#allocation4], 1 }
 0x21f   :  { %1144 = vsyncpa [#allocation4 + $0x1], 1 }

</bundles_post_ra>
